<compile_context>
chip_gen: v7x
topology: tpu7x:2x2x1
jax: 0.10.0
libtpu: 0.0.40
codegen_flags: <defaults>
</compile_context>

<pallas_src>
import functools

import jax
import jax.numpy as jnp
from jax.experimental import pallas as pl
from jax.experimental.pallas import tpu as pltpu


# =============================================================================
# Fused kernel: conv1+BN1+ReLU -> conv2+BN2+ReLU -> conv3+BN3 -> +shortcut -> ReLU
# =============================================================================

def _bottleneck_kernel(*refs, tap_h, tap_w, sc_off, identity_sc):
    """One image per grid step, entirely in VMEM.

    `tap_h`/`tap_w` are the static start offsets of the nine 3x3 taps inside
    the padded h1 scratch (stride-2 uses the parity re-ordered layout built by
    the wrapper, which keeps every tap a contiguous static slice).
    """
    if identity_sc:
        (x_ref, w1_ref, b1_ref, w2_ref, b2_ref, w3_ref, b3_ref,
         o_ref, h1p_ref) = refs
        wsc_ref = bsc_ref = None
    else:
        (x_ref, w1_ref, b1_ref, w2_ref, b2_ref, w3_ref, b3_ref,
         wsc_ref, bsc_ref, o_ref, h1p_ref) = refs

    _, H, W, cin = x_ref.shape
    _, Ho, Wo, cout = o_ref.shape
    planes = h1p_ref.shape[-1]
    mm_dtype = w1_ref.dtype

    # Zero the padded scratch (only the 1-px halo actually needs it; a full
    # memset is cheap and stays correct when the batch axis is sharded across
    # TensorCores, unlike a program_id==0 guard).
    h1p_ref[...] = jnp.zeros_like(h1p_ref)

    x = x_ref[0]                                      # (H, W, Cin), f32
    x2d = x.reshape(H * W, cin)

    # ---- conv1 (1x1) + BN1 + ReLU  (Dropout2d == identity in eval) ---------
    h1 = jnp.dot(x2d.astype(mm_dtype), w1_ref[...],
                 preferred_element_type=jnp.float32)
    h1 = jnp.maximum(h1 + b1_ref[...], 0.0)
    h1p_ref[1:H + 1, 1:W + 1, :] = h1.reshape(H, W, planes).astype(mm_dtype)

    # ---- conv2 (3x3, pad=1, stride via layout) + BN2 + ReLU -----------------
    # Assemble the (Ho*Wo, 9*planes) im2col tile directly in VMEM from the
    # padded scratch (static slices only) and do a single MXU matmul.
    patches = []
    for kh in range(3):
        for kw in range(3):
            p = h1p_ref[tap_h[kh]:tap_h[kh] + Ho, tap_w[kw]:tap_w[kw] + Wo, :]
            patches.append(p.reshape(Ho * Wo, planes))
    cols = jnp.concatenate(patches, axis=-1)          # (Ho*Wo, 9*planes)
    h2 = jnp.dot(cols, w2_ref[...], preferred_element_type=jnp.float32)
    h2 = jnp.maximum(h2 + b2_ref[...], 0.0)

    # ---- conv3 (1x1) + BN3 ---------------------------------------------------
    main = jnp.dot(h2.astype(mm_dtype), w3_ref[...],
                   preferred_element_type=jnp.float32) + b3_ref[...]

    # ---- shortcut + add + ReLU ----------------------------------------------
    if identity_sc:
        sc = x2d                                      # exact f32 identity add
    else:
        h0, w0 = sc_off
        xs = x[h0:h0 + Ho, w0:w0 + Wo, :].reshape(Ho * Wo, cin)
        sc = jnp.dot(xs.astype(mm_dtype), wsc_ref[...],
                     preferred_element_type=jnp.float32) + bsc_ref[...]

    out = jnp.maximum(main + sc, 0.0)
    o_ref[...] = out.reshape(1, Ho, Wo, cout).astype(o_ref.dtype)


# =============================================================================
# Parameter prep / wrapper
# =============================================================================

def _fold_bn(gamma, beta, mean, var, eps=1e-5):
    scale = gamma / jnp.sqrt(var + eps)
    bias = beta - mean * scale
    return scale.astype(jnp.float32), bias.astype(jnp.float32)


def _vmem_limit_bytes(h, w, ho, wo, cin, planes, cout, has_proj, mm_bytes):
    f32 = 4
    need = 2 * (h * w * cin + ho * wo * cout) * f32          # dbl-buffered x / out blocks
    wts = cin * planes + 9 * planes * planes + planes * cout
    if has_proj:
        wts += cin * cout
    need += 2 * wts * mm_bytes + 4 * (planes + cout) * f32   # weights + biases
    need += (h + 2) * (w + 2) * planes * mm_bytes            # padded h1 scratch
    need += (h * w * planes * f32 + ho * wo * 9 * planes * mm_bytes
             + 3 * ho * wo * cout * f32 + h * w * cin * mm_bytes)  # live values
    return int(min(max(2 * need, 32 * 1024 * 1024), 64 * 1024 * 1024))


def bottleneck_forward(params, x_nchw, stride=1, use_bf16_matmul=False):
    """Inference forward of the Bottleneck block; input/output are NCHW f32."""
    n, cin, h, w = x_nchw.shape
    planes = params['conv1'].shape[0]
    cout = params['conv3'].shape[0]
    has_proj = 'sc_conv' in params

    if stride == 1:
        ho, wo = h, w
        tap_h, tap_w = (0, 1, 2), (0, 1, 2)
        sc_off = (0, 0)
    elif stride == 2:
        if h % 2 or w % 2:
            raise NotImplementedError("stride-2 path assumes even H and W")
        ho, wo = h // 2, w // 2
        # parity re-ordered layout (odd rows/cols first, then even):
        # tap k in {0,1,2} -> static start offset in the padded scratch.
        tap_h, tap_w = (0, ho + 1, 1), (0, wo + 1, 1)
        sc_off = (ho, wo)       # even rows/cols live in the second half
    else:
        raise NotImplementedError("Bottleneck only uses stride 1 or 2")
    if not has_proj:
        assert stride == 1 and cin == cout, \
            "identity shortcut requires stride==1 and in_planes == 4*planes"

    mm_dtype = jnp.bfloat16 if use_bf16_matmul else jnp.float32
    mm_bytes = 2 if use_bf16_matmul else 4

    # NCHW -> NHWC (+ parity re-order of H/W for stride 2 so every 3x3 tap in
    # the kernel is a static contiguous slice: no HBM im2col, no strided loads)
    x = jnp.transpose(x_nchw, (0, 2, 3, 1)).astype(jnp.float32)
    if stride == 2:
        x = jnp.concatenate([x[:, 1::2], x[:, 0::2]], axis=1)
        x = jnp.concatenate([x[:, :, 1::2], x[:, :, 0::2]], axis=2)

    # Fold the BN scale into the conv weight columns; keep only the bias.
    s1, b1 = _fold_bn(*params['bn1'])
    s2, b2 = _fold_bn(*params['bn2'])
    s3, b3 = _fold_bn(*params['bn3'])
    w1 = (params['conv1'][:, :, 0, 0].T * s1[None, :]).astype(mm_dtype)
    w2 = (jnp.transpose(params['conv2'], (2, 3, 1, 0)).reshape(9 * planes, planes)
          * s2[None, :]).astype(mm_dtype)
    w3 = (params['conv3'][:, :, 0, 0].T * s3[None, :]).astype(mm_dtype)
    b1 = b1.reshape(1, planes)
    b2 = b2.reshape(1, planes)
    b3 = b3.reshape(1, cout)

    operands = [x, w1, b1, w2, b2, w3, b3]
    in_specs = [
        pl.BlockSpec((1, h, w, cin), lambda b: (b, 0, 0, 0)),
        pl.BlockSpec((cin, planes), lambda b: (0, 0)),
        pl.BlockSpec((1, planes), lambda b: (0, 0)),
        pl.BlockSpec((9 * planes, planes), lambda b: (0, 0)),
        pl.BlockSpec((1, planes), lambda b: (0, 0)),
        pl.BlockSpec((planes, cout), lambda b: (0, 0)),
        pl.BlockSpec((1, cout), lambda b: (0, 0)),
    ]
    if has_proj:
        ssc, bsc = _fold_bn(*params['sc_bn'])
        wsc = (params['sc_conv'][:, :, 0, 0].T * ssc[None, :]).astype(mm_dtype)
        operands += [wsc, bsc.reshape(1, cout)]
        in_specs += [pl.BlockSpec((cin, cout), lambda b: (0, 0)),
                     pl.BlockSpec((1, cout), lambda b: (0, 0))]

    flops = 2 * n * (h * w * cin * planes
                     + ho * wo * 9 * planes * planes
                     + ho * wo * planes * cout
                     + (ho * wo * cin * cout if has_proj else 0))
    bytes_accessed = int(sum(o.size * o.dtype.itemsize for o in operands)
                         + n * ho * wo * cout * 4)

    kernel = functools.partial(
        _bottleneck_kernel, tap_h=tap_h, tap_w=tap_w, sc_off=sc_off,
        identity_sc=not has_proj)

    out = pl.pallas_call(
        kernel,
        out_shape=jax.ShapeDtypeStruct((n, ho, wo, cout), jnp.float32),
        grid=(n,),
        in_specs=in_specs,
        out_specs=pl.BlockSpec((1, ho, wo, cout), lambda b: (b, 0, 0, 0)),
        scratch_shapes=[pltpu.VMEM((h + 2, w + 2, planes), mm_dtype)],
        compiler_params=pltpu.CompilerParams(
            dimension_semantics=("parallel",),
            vmem_limit_bytes=_vmem_limit_bytes(
                h, w, ho, wo, cin, planes, cout, has_proj, mm_bytes)),
        cost_estimate=pl.CostEstimate(flops=flops, transcendentals=0,
                                      bytes_accessed=bytes_accessed),
    )(*operands)

    return jnp.transpose(out, (0, 3, 1, 2))   # back to NCHW


# =============================================================================
# Parameter construction + pure-JAX reference (for the correctness check)
# =============================================================================

def _conv_weight(key, cout, cin, k):
    fan_in = cin * k * k
    bound = 1.0 / jnp.sqrt(jnp.float32(fan_in))
    return jax.random.uniform(key, (cout, cin, k, k), jnp.float32, -bound, bound)


def _bn_params(key, c):
    k1, k2, k3, k4 = jax.random.split(key, 4)
    gamma = 1.0 + 0.1 * jax.random.normal(k1, (c,), jnp.float32)
    beta = 0.1 * jax.random.normal(k2, (c,), jnp.float32)
    mean = 0.1 * jax.random.normal(k3, (c,), jnp.float32)
    var = 1.0 + 0.1 * jax.random.uniform(k4, (c,), jnp.float32)
    return gamma, beta, mean, var


def init_bottleneck_params(key, in_planes, planes, stride, expansion=4):
    keys = jax.random.split(key, 8)
    p = {
        'conv1': _conv_weight(keys[0], planes, in_planes, 1),
        'bn1': _bn_params(keys[1], planes),
        'conv2': _conv_weight(keys[2], planes, planes, 3),
        'bn2': _bn_params(keys[3], planes),
        'conv3': _conv_weight(keys[4], expansion * planes, planes, 1),
        'bn3': _bn_params(keys[5], expansion * planes),
    }
    if stride != 1 or in_planes != expansion * planes:
        p['sc_conv'] = _conv_weight(keys[6], expansion * planes, in_planes, 1)
        p['sc_bn'] = _bn_params(keys[7], expansion * planes)
    return p


def bottleneck_reference(params, x_nchw, stride=1, eps=1e-5):
    """Plain-JAX (lax.conv) reference with identical inference semantics."""
    def conv(x, w, s, p):
        return jax.lax.conv_general_dilated(
            x, w, window_strides=(s, s), padding=[(p, p), (p, p)],
            dimension_numbers=('NCHW', 'OIHW', 'NCHW'))

    def bn(x, prm):
        gamma, beta, mean, var = prm
        inv = gamma / jnp.sqrt(var + eps)
        return x * inv[None, :, None, None] + (beta - mean * inv)[None, :, None, None]

    out = jax.nn.relu(bn(conv(x_nchw, params['conv1'], 1, 0), params['bn1']))
    out = jax.nn.relu(bn(conv(out, params['conv2'], stride, 1), params['bn2']))
    out = bn(conv(out, params['conv3'], 1, 0), params['bn3'])
    if 'sc_conv' in params:
        sc = bn(conv(x_nchw, params['sc_conv'], stride, 0), params['sc_bn'])
    else:
        sc = x_nchw
    return jax.nn.relu(out + sc)


if __name__ == "__main__":
    key = jax.random.PRNGKey(0)

    # (in_planes, planes, stride, spatial) — covers projection / identity /
    # strided-projection shortcut paths of Bottleneck.
    configs = [
        (4, 8, 1, 16),    # projection shortcut (channel mismatch)
        (32, 8, 1, 16),   # identity shortcut
        (16, 8, 2, 16),   # strided projection shortcut
    ]

    fwd = jax.jit(bottleneck_forward,
                  static_argnames=("stride", "use_bf16_matmul"))

    for idx, (cin, planes, stride, hw) in enumerate(configs):
        kp, kx, key = jax.random.split(key, 3)
        params = init_bottleneck_params(kp, cin, planes, stride)
        x = jax.random.normal(kx, (2, cin, hw, hw), jnp.float32)  # NCHW

        y = jax.block_until_ready(fwd(params, x, stride=stride))
        ho = (hw - 1) // stride + 1
        assert y.shape == (2, 4 * planes, ho, ho), (idx, y.shape)

        y_ref = jax.block_until_ready(bottleneck_reference(params, x, stride))
        err = float(jnp.max(jnp.abs(y - y_ref)))
        assert err < 1e-2, f"config {idx}: max abs err = {err}"

    # bf16 MXU-input path (v6e/v7x perf option): f32 accumulation, looser tol.
    y16 = jax.block_until_ready(
        fwd(params, x, stride=stride, use_bf16_matmul=True))
    err16 = float(jnp.max(jnp.abs(y16 - y_ref)))
    assert err16 < 1e-1, f"bf16 path: max abs err = {err16}"

    print("KERNEL_OK")
</pallas_src>

<mosaic_0001>
module attributes {stable_mosaic.version = 11 : i64} {
  func.func @_bottleneck_kernel(%arg0: i32, %arg1: memref<1x16x16x4xf32, #tpu.memory_space<vmem>>, %arg2: memref<4x8xf32, #tpu.memory_space<vmem>>, %arg3: memref<1x8xf32, #tpu.memory_space<vmem>>, %arg4: memref<72x8xf32, #tpu.memory_space<vmem>>, %arg5: memref<1x8xf32, #tpu.memory_space<vmem>>, %arg6: memref<8x32xf32, #tpu.memory_space<vmem>>, %arg7: memref<1x32xf32, #tpu.memory_space<vmem>>, %arg8: memref<4x32xf32, #tpu.memory_space<vmem>>, %arg9: memref<1x32xf32, #tpu.memory_space<vmem>>, %arg10: memref<1x16x16x32xf32, #tpu.memory_space<vmem>>, %arg11: memref<18x18x8xf32, #tpu.memory_space<vmem>>) attributes {dimension_semantics = [#tpu.dimension_semantics<parallel>], iteration_bounds = array<i64: 2>, scalar_prefetch = 0 : i64, scratch_operands = 1 : i64, tpu.core_type = #tpu.core_type<tc>, window_params = [{transform_indices = @transform_0, window_bounds = array<i64: 1, 16, 16, 4>}, {pipeline_mode = #tpu.pipeline_mode<synchronous>, transform_indices = @transform_1, window_bounds = array<i64: 4, 8>}, {pipeline_mode = #tpu.pipeline_mode<synchronous>, transform_indices = @transform_2, window_bounds = array<i64: 1, 8>}, {pipeline_mode = #tpu.pipeline_mode<synchronous>, transform_indices = @transform_3, window_bounds = array<i64: 72, 8>}, {pipeline_mode = #tpu.pipeline_mode<synchronous>, transform_indices = @transform_4, window_bounds = array<i64: 1, 8>}, {pipeline_mode = #tpu.pipeline_mode<synchronous>, transform_indices = @transform_5, window_bounds = array<i64: 8, 32>}, {pipeline_mode = #tpu.pipeline_mode<synchronous>, transform_indices = @transform_6, window_bounds = array<i64: 1, 32>}, {pipeline_mode = #tpu.pipeline_mode<synchronous>, transform_indices = @transform_7, window_bounds = array<i64: 4, 32>}, {pipeline_mode = #tpu.pipeline_mode<synchronous>, transform_indices = @transform_8, window_bounds = array<i64: 1, 32>}, {transform_indices = @transform_9, window_bounds = array<i64: 1, 16, 16, 32>}]} {
    %cst = arith.constant 0.000000e+00 : f32
    %0 = vector.broadcast %cst : f32 to vector<18x18x8xf32>
    %c0 = arith.constant 0 : index
    %c0_0 = arith.constant 0 : index
    %c0_1 = arith.constant 0 : index
    %1 = vector.load %arg11[%c0, %c0_0, %c0_1] : memref<18x18x8xf32, #tpu.memory_space<vmem>>, vector<18x18x8xf32>
    tpu.vector_store %arg11[%c0, %c0_0, %c0_1], %0 {strides = array<i32>} : memref<18x18x8xf32, #tpu.memory_space<vmem>>, vector<18x18x8xf32>,
    %c0_2 = arith.constant 0 : index
    %c0_3 = arith.constant 0 : index
    %c0_4 = arith.constant 0 : index
    %c0_5 = arith.constant 0 : index
    %2 = vector.load %arg1[%c0_2, %c0_3, %c0_4, %c0_5] : memref<1x16x16x4xf32, #tpu.memory_space<vmem>>, vector<1x16x16x4xf32>
    %3 = vector.shape_cast %2 : vector<1x16x16x4xf32> to vector<16x16x4xf32>
    %4 = vector.shape_cast %3 : vector<16x16x4xf32> to vector<256x4xf32>
    %c0_6 = arith.constant 0 : index
    %c0_7 = arith.constant 0 : index
    %5 = vector.load %arg2[%c0_6, %c0_7] : memref<4x8xf32, #tpu.memory_space<vmem>>, vector<4x8xf32>
    %cst_8 = arith.constant dense<0.000000e+00> : vector<256x8xf32>
    %6 = tpu.matmul %4, %5, %cst_8 {dimension_numbers = #tpu.dot_dimension_numbers<[1], [0], [0], [1], [0, 0, 1, 1], [], []>} : vector<256x4xf32>, vector<4x8xf32>, vector<256x8xf32> -> vector<256x8xf32>
    %c0_9 = arith.constant 0 : index
    %c0_10 = arith.constant 0 : index
    %7 = vector.load %arg3[%c0_9, %c0_10] : memref<1x8xf32, #tpu.memory_space<vmem>>, vector<1x8xf32>
    %8 = vector.broadcast %7 : vector<1x8xf32> to vector<256x8xf32>
    %9 = arith.addf %6, %8 : vector<256x8xf32>
    %cst_11 = arith.constant 0.000000e+00 : f32
    %10 = vector.broadcast %cst_11 : f32 to vector<256x8xf32>
    %11 = arith.maximumf %9, %10 : vector<256x8xf32>
    %12 = vector.shape_cast %11 : vector<256x8xf32> to vector<16x16x8xf32>
    %c1 = arith.constant 1 : index
    %c1_12 = arith.constant 1 : index
    %c0_13 = arith.constant 0 : index
    %13 = vector.load %arg11[%c1, %c1_12, %c0_13] : memref<18x18x8xf32, #tpu.memory_space<vmem>>, vector<16x16x8xf32>
    tpu.vector_store %arg11[%c1, %c1_12, %c0_13], %12 {strides = array<i32>} : memref<18x18x8xf32, #tpu.memory_space<vmem>>, vector<16x16x8xf32>,
    %c0_14 = arith.constant 0 : index
    %c0_15 = arith.constant 0 : index
    %c0_16 = arith.constant 0 : index
    %14 = vector.load %arg11[%c0_14, %c0_15, %c0_16] : memref<18x18x8xf32, #tpu.memory_space<vmem>>, vector<16x16x8xf32>
    %15 = vector.shape_cast %14 : vector<16x16x8xf32> to vector<256x8xf32>
    %c0_17 = arith.constant 0 : index
    %c1_18 = arith.constant 1 : index
    %c0_19 = arith.constant 0 : index
    %16 = vector.load %arg11[%c0_17, %c1_18, %c0_19] : memref<18x18x8xf32, #tpu.memory_space<vmem>>, vector<16x16x8xf32>
    %17 = vector.shape_cast %16 : vector<16x16x8xf32> to vector<256x8xf32>
    %c0_20 = arith.constant 0 : index
    %c2 = arith.constant 2 : index
    %c0_21 = arith.constant 0 : index
    %18 = vector.load %arg11[%c0_20, %c2, %c0_21] : memref<18x18x8xf32, #tpu.memory_space<vmem>>, vector<16x16x8xf32>
    %19 = vector.shape_cast %18 : vector<16x16x8xf32> to vector<256x8xf32>
    %c1_22 = arith.constant 1 : index
    %c0_23 = arith.constant 0 : index
    %c0_24 = arith.constant 0 : index
    %20 = vector.load %arg11[%c1_22, %c0_23, %c0_24] : memref<18x18x8xf32, #tpu.memory_space<vmem>>, vector<16x16x8xf32>
    %21 = vector.shape_cast %20 : vector<16x16x8xf32> to vector<256x8xf32>
    %c1_25 = arith.constant 1 : index
    %c1_26 = arith.constant 1 : index
    %c0_27 = arith.constant 0 : index
    %22 = vector.load %arg11[%c1_25, %c1_26, %c0_27] : memref<18x18x8xf32, #tpu.memory_space<vmem>>, vector<16x16x8xf32>
    %23 = vector.shape_cast %22 : vector<16x16x8xf32> to vector<256x8xf32>
    %c1_28 = arith.constant 1 : index
    %c2_29 = arith.constant 2 : index
    %c0_30 = arith.constant 0 : index
    %24 = vector.load %arg11[%c1_28, %c2_29, %c0_30] : memref<18x18x8xf32, #tpu.memory_space<vmem>>, vector<16x16x8xf32>
    %25 = vector.shape_cast %24 : vector<16x16x8xf32> to vector<256x8xf32>
    %c2_31 = arith.constant 2 : index
    %c0_32 = arith.constant 0 : index
    %c0_33 = arith.constant 0 : index
    %26 = vector.load %arg11[%c2_31, %c0_32, %c0_33] : memref<18x18x8xf32, #tpu.memory_space<vmem>>, vector<16x16x8xf32>
    %27 = vector.shape_cast %26 : vector<16x16x8xf32> to vector<256x8xf32>
    %c2_34 = arith.constant 2 : index
    %c1_35 = arith.constant 1 : index
    %c0_36 = arith.constant 0 : index
    %28 = vector.load %arg11[%c2_34, %c1_35, %c0_36] : memref<18x18x8xf32, #tpu.memory_space<vmem>>, vector<16x16x8xf32>
    %29 = vector.shape_cast %28 : vector<16x16x8xf32> to vector<256x8xf32>
    %c2_37 = arith.constant 2 : index
    %c2_38 = arith.constant 2 : index
    %c0_39 = arith.constant 0 : index
    %30 = vector.load %arg11[%c2_37, %c2_38, %c0_39] : memref<18x18x8xf32, #tpu.memory_space<vmem>>, vector<16x16x8xf32>
    %31 = vector.shape_cast %30 : vector<16x16x8xf32> to vector<256x8xf32>
    %32 = tpu.concatenate %15, %17, %19, %21, %23, %25, %27, %29, %31 in 1 : vector<256x8xf32>, vector<256x8xf32>, vector<256x8xf32>, vector<256x8xf32>, vector<256x8xf32>, vector<256x8xf32>, vector<256x8xf32>, vector<256x8xf32>, vector<256x8xf32> -> vector<256x72xf32>
    %c0_40 = arith.constant 0 : index
    %c0_41 = arith.constant 0 : index
    %33 = vector.load %arg4[%c0_40, %c0_41] : memref<72x8xf32, #tpu.memory_space<vmem>>, vector<72x8xf32>
    %cst_42 = arith.constant dense<0.000000e+00> : vector<256x8xf32>
    %34 = tpu.matmul %32, %33, %cst_42 {dimension_numbers = #tpu.dot_dimension_numbers<[1], [0], [0], [1], [0, 0, 1, 1], [], []>} : vector<256x72xf32>, vector<72x8xf32>, vector<256x8xf32> -> vector<256x8xf32>
    %c0_43 = arith.constant 0 : index
    %c0_44 = arith.constant 0 : index
    %35 = vector.load %arg5[%c0_43, %c0_44] : memref<1x8xf32, #tpu.memory_space<vmem>>, vector<1x8xf32>
    %36 = vector.broadcast %35 : vector<1x8xf32> to vector<256x8xf32>
    %37 = arith.addf %34, %36 : vector<256x8xf32>
    %cst_45 = arith.constant 0.000000e+00 : f32
    %38 = vector.broadcast %cst_45 : f32 to vector<256x8xf32>
    %39 = arith.maximumf %37, %38 : vector<256x8xf32>
    %c0_46 = arith.constant 0 : index
    %c0_47 = arith.constant 0 : index
    %40 = vector.load %arg6[%c0_46, %c0_47] : memref<8x32xf32, #tpu.memory_space<vmem>>, vector<8x32xf32>
    %cst_48 = arith.constant dense<0.000000e+00> : vector<256x32xf32>
    %41 = tpu.matmul %39, %40, %cst_48 {dimension_numbers = #tpu.dot_dimension_numbers<[1], [0], [0], [1], [0, 0, 1, 1], [], []>} : vector<256x8xf32>, vector<8x32xf32>, vector<256x32xf32> -> vector<256x32xf32>
    %c0_49 = arith.constant 0 : index
    %c0_50 = arith.constant 0 : index
    %42 = vector.load %arg7[%c0_49, %c0_50] : memref<1x32xf32, #tpu.memory_space<vmem>>, vector<1x32xf32>
    %43 = vector.broadcast %42 : vector<1x32xf32> to vector<256x32xf32>
    %44 = arith.addf %41, %43 : vector<256x32xf32>
    %45 = vector.shape_cast %3 : vector<16x16x4xf32> to vector<256x4xf32>
    %c0_51 = arith.constant 0 : index
    %c0_52 = arith.constant 0 : index
    %46 = vector.load %arg8[%c0_51, %c0_52] : memref<4x32xf32, #tpu.memory_space<vmem>>, vector<4x32xf32>
    %cst_53 = arith.constant dense<0.000000e+00> : vector<256x32xf32>
    %47 = tpu.matmul %45, %46, %cst_53 {dimension_numbers = #tpu.dot_dimension_numbers<[1], [0], [0], [1], [0, 0, 1, 1], [], []>} : vector<256x4xf32>, vector<4x32xf32>, vector<256x32xf32> -> vector<256x32xf32>
    %c0_54 = arith.constant 0 : index
    %c0_55 = arith.constant 0 : index
    %48 = vector.load %arg9[%c0_54, %c0_55] : memref<1x32xf32, #tpu.memory_space<vmem>>, vector<1x32xf32>
    %49 = vector.broadcast %48 : vector<1x32xf32> to vector<256x32xf32>
    %50 = arith.addf %47, %49 : vector<256x32xf32>
    %51 = arith.addf %44, %50 : vector<256x32xf32>
    %cst_56 = arith.constant 0.000000e+00 : f32
    %52 = vector.broadcast %cst_56 : f32 to vector<256x32xf32>
    %53 = arith.maximumf %51, %52 : vector<256x32xf32>
    %54 = vector.shape_cast %53 : vector<256x32xf32> to vector<1x16x16x32xf32>
    %c0_57 = arith.constant 0 : index
    %c0_58 = arith.constant 0 : index
    %c0_59 = arith.constant 0 : index
    %c0_60 = arith.constant 0 : index
    %55 = vector.load %arg10[%c0_57, %c0_58, %c0_59, %c0_60] : memref<1x16x16x32xf32, #tpu.memory_space<vmem>>, vector<1x16x16x32xf32>
    tpu.vector_store %arg10[%c0_57, %c0_58, %c0_59, %c0_60], %54 {strides = array<i32>} : memref<1x16x16x32xf32, #tpu.memory_space<vmem>>, vector<1x16x16x32xf32>,
    return
  }
  func.func @transform_0(%arg0: i32) -> (i32, i32, i32, i32) {
    %c0_i32 = arith.constant 0 : i32
    %c0_i32_0 = arith.constant 0 : i32
    %c0_i32_1 = arith.constant 0 : i32
    %c0_i32_2 = arith.constant 0 : i32
    return %arg0, %c0_i32, %c0_i32_0, %c0_i32_1 : i32, i32, i32, i32
  }
  func.func @transform_1(%arg0: i32) -> (i32, i32) {
    %c0_i32 = arith.constant 0 : i32
    %c0_i32_0 = arith.constant 0 : i32
    %c0_i32_1 = arith.constant 0 : i32
    return %c0_i32, %c0_i32_0 : i32, i32
  }
  func.func @transform_2(%arg0: i32) -> (i32, i32) {
    %c0_i32 = arith.constant 0 : i32
    %c0_i32_0 = arith.constant 0 : i32
    %c0_i32_1 = arith.constant 0 : i32
    return %c0_i32, %c0_i32_0 : i32, i32
  }
  func.func @transform_3(%arg0: i32) -> (i32, i32) {
    %c0_i32 = arith.constant 0 : i32
    %c0_i32_0 = arith.constant 0 : i32
    %c0_i32_1 = arith.constant 0 : i32
    return %c0_i32, %c0_i32_0 : i32, i32
  }
  func.func @transform_4(%arg0: i32) -> (i32, i32) {
    %c0_i32 = arith.constant 0 : i32
    %c0_i32_0 = arith.constant 0 : i32
    %c0_i32_1 = arith.constant 0 : i32
    return %c0_i32, %c0_i32_0 : i32, i32
  }
  func.func @transform_5(%arg0: i32) -> (i32, i32) {
    %c0_i32 = arith.constant 0 : i32
    %c0_i32_0 = arith.constant 0 : i32
    %c0_i32_1 = arith.constant 0 : i32
    return %c0_i32, %c0_i32_0 : i32, i32
  }
  func.func @transform_6(%arg0: i32) -> (i32, i32) {
    %c0_i32 = arith.constant 0 : i32
    %c0_i32_0 = arith.constant 0 : i32
    %c0_i32_1 = arith.constant 0 : i32
    return %c0_i32, %c0_i32_0 : i32, i32
  }
  func.func @transform_7(%arg0: i32) -> (i32, i32) {
    %c0_i32 = arith.constant 0 : i32
    %c0_i32_0 = arith.constant 0 : i32
    %c0_i32_1 = arith.constant 0 : i32
    return %c0_i32, %c0_i32_0 : i32, i32
  }
  func.func @transform_8(%arg0: i32) -> (i32, i32) {
    %c0_i32 = arith.constant 0 : i32
    %c0_i32_0 = arith.constant 0 : i32
    %c0_i32_1 = arith.constant 0 : i32
    return %c0_i32, %c0_i32_0 : i32, i32
  }
  func.func @transform_9(%arg0: i32) -> (i32, i32, i32, i32) {
    %c0_i32 = arith.constant 0 : i32
    %c0_i32_0 = arith.constant 0 : i32
    %c0_i32_1 = arith.constant 0 : i32
    %c0_i32_2 = arith.constant 0 : i32
    return %arg0, %c0_i32, %c0_i32_0, %c0_i32_1 : i32, i32, i32, i32
  }
}

</mosaic_0001>

<bundles_post_ra>
// kernel: bottleneck_forward.1
= control target key start
LH: loop header
LB: loop body
LE: loop exit
PB: predicated region body
PF: predicated region fallthrough
CT: control target
= control target key end

     0   :  { %14 = vsyncpa [#allocation4], 0  ;;  %s5902_s0 = inlined_call_operand.vmem [shape: f32[2,16,16,4], index: 0, kind: input, shape index: {}]   ;;  %s5903_s1 = inlined_call_operand.vmem [shape: f32[4,8], index: 1, kind: input, shape index: {}]   ;;  %s5904_s2 = inlined_call_operand.vmem [shape: f32[1,8], index: 2, kind: input, shape index: {}]   ;;  %s5905_s3 = inlined_call_operand.vmem [shape: f32[72,8], index: 3, kind: input, shape index: {}]   ;;  %s5906_s4 = inlined_call_operand.vmem [shape: f32[1,8], index: 4, kind: input, shape index: {}]   ;;  %s5907_s5 = inlined_call_operand.vmem [shape: f32[8,32], index: 5, kind: input, shape index: {}]   ;;  %s5908_s6 = inlined_call_operand.vmem [shape: f32[1,32], index: 6, kind: input, shape index: {}]   ;;  %s5909_s7 = inlined_call_operand.vmem [shape: f32[4,32], index: 7, kind: input, shape index: {}]   ;;  %s5910_s8 = inlined_call_operand.vmem [shape: f32[1,32], index: 8, kind: input, shape index: {}]   ;;  %s5911_s9 = inlined_call_operand.hbm [shape: f32[2,16,16,32], index: 9, kind: output, shape index: {}]  }
   0x1   :  { %16 = vsyncpa [#allocation4 + $0x1], 0  ;;  %s4323_s30 = smov 0   ;;  %s4325_s10 = smov 0  }
   0x2   :  { %s4327_s11 = smov 0   ;;  %s4329_s12 = smov 0  }
   0x3 LB: > { %s4344_s13 = sadd.s32 4294967295, %s4260_s12   ;;  %s3501_s14 = sadd.s32 4294967294, %s4260_s12   ;;  %s4260_s12 = sphi %s4329_s12, %s5920_s12   ;;  %s4256_s11 = sphi %s4327_s11, %s5919_s11   ;;  %s4252_s10 = sphi %s4325_s10, %s5918_s10   ;;  %s4248_s30 = sphi %s4323_s30, %s5917_s30  }
   0x4   : > { %s4348_s15 = sadd.s32 1, %s4260_s12   ;;  %s223_s16 = sadd.s32 1, %s4256_s11 }
   0x5   : > { %s220_s17 = ssub.s32 %s4260_s12, %s4348_s15  ;;  %p233_p0 = scmp.ne.s32.totalorder %s4256_s11, %s4252_s10 }
   0x6   : > { %p221_p1 = scmp.eq.s32.totalorder %s220_s17, 0  ;;  %p234_p2 = scmp.eq.s32.totalorder %s4344_s13, 1 }
   0x7   : > { %p239_p3 = scmp.ne.s32.totalorder %s4252_s10, %s4248_s30  ;;  %p240_p4 = scmp.eq.s32.totalorder %s3501_s14, 1 }
   0x8   : > { %s4359_s18 = scalar_select %p221_p1, %s4256_s11, %s223_s16  }
   0x9   : > { %p4361_p5 = por %p234_p2, %p233_p0  ;;  %p4365_p6 = por %p240_p4, %p239_p3 }
   0xa   : > { %p3504_p7 = scmp.ge.s32.totalorder %s4260_s12, 1  ;;  %p290_p8 = scmp.lt.s32.totalorder %s4260_s12, 3 }
   0xc   : > { %p291_p9 = pnand %p3504_p7, %p290_p8 }
   0xd   : > { %v419_v0 = vld [vmem:[%s5903_s1] sm:$0xf] (!%p291_p9)  ;;  %vm524_vm0 = vcmask (!%p291_p9), 1043456   ;;  %p326_p10 = scmp.lt.s32.totalorder (!%p291_p9), %s4344_s13, 1  ;;  %vm331_vm1 = vcmask (!%p291_p9), 64512   ;;  %vm334_vm2 = vcmask (!%p291_p9), 58368  }
   0xe   : > { %294 = sbr.rel (%p291_p9) target bundleno = 1382 (0x566), region = 56  ;;  %3789 = vmatprep.subr.msk.mxu1 (!%p291_p9), %vm524_vm0, %v419_v0  ;;  %v4262_v1 = vmov (!%p291_p9), 0.0   ;;  %vm427_vm3 = vcmask (!%p291_p9), 31744   ;;  %s4263_s28 = smov (!%p291_p9), 8   ;;  %v4495_v30 = vld [vmem:[%s5904_s2] ss:$0 sm:$0xff] (!%p291_p9) }
   0xf   : > { %3790 = vmatpush3.msk.msra.mxu1 (!%p291_p9), %vm524_vm0, %v419_v0  ;;  %337 = vst.msk [vmem:[#allocation2 + $0x20] sm:$0xff] (!%p291_p9), %vm331_vm1, %v4262_v1  ;;  %332 = vst.msk [vmem:[#allocation2] sm:$0xff] (!%p291_p9), %vm331_vm1, %v4262_v1  ;;  %s4264_s29 = smov (!%p291_p9), 16   ;;  %s4265_s17 = smov (!%p291_p9), 32   ;;  %vm2163_vm4 = vcmask (!%p291_p9), 130048   ;;  %vm2196_vm5 = vcmask (!%p291_p9), 195584  }
  0x10   : > { %338 = vst.msk [vmem:[#allocation2 + $0x28] sm:$0x3] (!%p291_p9), %vm334_vm2, %v4262_v1  ;;  %335 = vst.msk [vmem:[#allocation2 + $0x10] sm:$0x3] (!%p291_p9), %vm334_vm2, %v4262_v1  ;;  %s4266_s21 = smov (!%p291_p9), 24   ;;  %s4267_s22 = smov (!%p291_p9), 40  }
  0x11   : > { %333 = vst.msk [vmem:[#allocation2 + $0x8] sm:$0xff] (!%p291_p9), %vm331_vm1, %v4262_v1  ;;  %336 = vst.msk [vmem:[#allocation2 + $0x18] sm:$0xff] (!%p291_p9), %vm331_vm1, %v4262_v1  ;;  %s4269_s16 = smov (!%p291_p9), 56   ;;  %s5916_s26 = smov (!%p291_p9), 64   ;;  %vm2229_vm6 = vcmask (!%p291_p9), 261120   ;;  %vm2262_vm7 = vcmask (!%p291_p9), 326656  }
  0x12   : > { %339 = vst.msk [vmem:[#allocation2 + $0x30] sm:$0xff] (!%p291_p9), %vm331_vm1, %v4262_v1  ;;  %340 = vst.msk [vmem:[#allocation2 + $0x38] sm:$0xff] (!%p291_p9), %vm331_vm1, %v4262_v1  ;;  %vm2295_vm8 = vcmask (!%p291_p9), 392192   ;;  %vm2328_vm9 = vcmask (!%p291_p9), 457728   ;;  %vm2361_vm10 = vcmask (!%p291_p9), 523264   ;;  %vm2410_vm11 = vcmask (!%p291_p9), 588800  }
  0x13   : > { %341 = vst.msk [vmem:[#allocation2 + $0x40] sm:$0x3] (!%p291_p9), %vm334_vm2, %v4262_v1  ;;  %344 = vst.msk [vmem:[#allocation2 + $0x58] sm:$0x3] (!%p291_p9), %vm334_vm2, %v4262_v1  ;;  %s3648_s25 = sshll.u32 (!%p291_p9), %s4344_s13, 12 }
  0x14   : > { %342 = vst.msk [vmem:[#allocation2 + $0x48] sm:$0xff] (!%p291_p9), %vm331_vm1, %v4262_v1  ;;  %343 = vst.msk [vmem:[#allocation2 + $0x50] sm:$0xff] (!%p291_p9), %vm331_vm1, %v4262_v1 }
  0x15   : > { %s4378_s23 = scalar_select %p326_p10, %s4344_s13, 1  ;;  %345 = vst.msk [vmem:[#allocation2 + $0x60] sm:$0xff] %vm331_vm1, %v4262_v1  ;;  %346 = vst.msk [vmem:[#allocation2 + $0x68] sm:$0xff] %vm331_vm1, %v4262_v1 }
  0x16   : > { %347 = vst.msk [vmem:[#allocation2 + $0x70] sm:$0x3] %vm334_vm2, %v4262_v1  ;;  %350 = vst.msk [vmem:[#allocation2 + $0x88] sm:$0x3] %vm334_vm2, %v4262_v1 }
  0x17   : > { %348 = vst.msk [vmem:[#allocation2 + $0x78] sm:$0xff] %vm331_vm1, %v4262_v1  ;;  %349 = vst.msk [vmem:[#allocation2 + $0x80] sm:$0xff] %vm331_vm1, %v4262_v1  ;;  %s3647_s24 = sshll.u32 %s4378_s23, 8  ;;  %s5912_s23 = smov 64  }
  0x18   : > { %351 = vst.msk [vmem:[#allocation2 + $0x90] sm:$0xff] %vm331_vm1, %v4262_v1  ;;  %352 = vst.msk [vmem:[#allocation2 + $0x98] sm:$0xff] %vm331_vm1, %v4262_v1  ;;  %s4438_s27 = scalar_lea.vmem %s5902_s0, %s3647_s24  ;;  %v850_v18 = vld [vmem:[#allocation2 + $0x1] sm:$0xff]  ;;  %v851_v20 = vld [vmem:[#allocation2 + $0x9] sm:$0xff] }
  0x19   : > { %353 = vst.msk [vmem:[#allocation2 + $0xa0] sm:$0x3] %vm334_vm2, %v4262_v1  ;;  %356 = vst.msk [vmem:[#allocation2 + $0xb8] sm:$0x3] %vm334_vm2, %v4262_v1  ;;  %v387_v2 = vld [vmem:[%s4438_s27] sm:$0xff]  ;;  %v388_v3 = vld [vmem:[%s4438_s27 + $0x8] sm:$0xff]  ;;  %1139 = vrot.lane.b32.xlu0 %v850_v18, %s4263_s28 }
  0x1a   : > { %354 = vst.msk [vmem:[#allocation2 + $0xa8] sm:$0xff] %vm331_vm1, %v4262_v1  ;;  %355 = vst.msk [vmem:[#allocation2 + $0xb0] sm:$0xff] %vm331_vm1, %v4262_v1  ;;  %v389_v4 = vld [vmem:[%s4438_s27 + $0x10] sm:$0xff]  ;;  %3791 = vmatprep.mubr.msk.f32.mxu1 %vm427_vm3, %v387_v2  ;;  %v390_v5 = vld [vmem:[%s4438_s27 + $0x18] sm:$0xff] }
  0x1b   : > { %357 = vst.msk [vmem:[#allocation2 + $0xc0] sm:$0xff] %vm331_vm1, %v4262_v1  ;;  %358 = vst.msk [vmem:[#allocation2 + $0xc8] sm:$0xff] %vm331_vm1, %v4262_v1  ;;  %3792 = vmatmul.mubr.msk.f32.vlgmr.msra.gmra.mrb[0].mxu1 %vm427_vm3, %v388_v3  ;;  %v391_v6 = vld [vmem:[%s4438_s27 + $0x20] sm:$0xff]  ;;  %v392_v7 = vld [vmem:[%s4438_s27 + $0x28] sm:$0xff] }
  0x1c   : > { %359 = vst.msk [vmem:[#allocation2 + $0xd0] sm:$0x3] %vm334_vm2, %v4262_v1  ;;  %362 = vst.msk [vmem:[#allocation2 + $0xe8] sm:$0x3] %vm334_vm2, %v4262_v1  ;;  %3794 = vmatprep.mubr.msk.f32.mxu1 %vm427_vm3, %v389_v4  ;;  %v393_v8 = vld [vmem:[%s4438_s27 + $0x30] sm:$0xff]  ;;  %v394_v9 = vld [vmem:[%s4438_s27 + $0x38] sm:$0xff] }
  0x1d   : > { %360 = vst.msk [vmem:[#allocation2 + $0xd8] sm:$0xff] %vm331_vm1, %v4262_v1  ;;  %361 = vst.msk [vmem:[#allocation2 + $0xe0] sm:$0xff] %vm331_vm1, %v4262_v1  ;;  %v395_v10 = vld [vmem:[%s4438_s27 + $0x40] sm:$0xff]  ;;  %v396_v11 = vld [vmem:[%s4438_s27 + $0x48] sm:$0xff]  ;;  %1141 = vrot.lane.b32.xlu0 %v851_v20, %s4263_s28 }
  0x1e   : > { %363 = vst.msk [vmem:[#allocation2 + $0xf0] sm:$0xff] %vm331_vm1, %v4262_v1  ;;  %364 = vst.msk [vmem:[#allocation2 + $0xf8] sm:$0xff] %vm331_vm1, %v4262_v1  ;;  %v397_v12 = vld [vmem:[%s4438_s27 + $0x50] sm:$0xff]  ;;  %v398_v13 = vld [vmem:[%s4438_s27 + $0x58] sm:$0xff] }
  0x1f   : > { %365 = vst.msk [vmem:[#allocation2 + $0x100] sm:$0x3] %vm334_vm2, %v4262_v1  ;;  %368 = vst.msk [vmem:[#allocation2 + $0x118] sm:$0x3] %vm334_vm2, %v4262_v1  ;;  %3795 = vmatmul.mubr.msk.f32.gmra.mrb[2].mxu1 %vm427_vm3, %v390_v5  ;;  %v399_v14 = vld [vmem:[%s4438_s27 + $0x60] sm:$0xff]  ;;  %v400_v15 = vld [vmem:[%s4438_s27 + $0x68] sm:$0xff] }
  0x20   : > { %366 = vst.msk [vmem:[#allocation2 + $0x108] sm:$0xff] %vm331_vm1, %v4262_v1  ;;  %367 = vst.msk [vmem:[#allocation2 + $0x110] sm:$0xff] %vm331_vm1, %v4262_v1  ;;  %3797 = vmatprep.mubr.msk.f32.mxu1 %vm427_vm3, %v391_v6  ;;  %v401_v16 = vld [vmem:[%s4438_s27 + $0x70] sm:$0xff]  ;;  %v402_v17 = vld [vmem:[%s4438_s27 + $0x78] sm:$0xff] }
  0x21   : > { %369 = vst.msk [vmem:[#allocation2 + $0x120] sm:$0xff] %vm331_vm1, %v4262_v1  ;;  %370 = vst.msk [vmem:[#allocation2 + $0x128] sm:$0xff] %vm331_vm1, %v4262_v1  ;;  %v882_v19 = vld [vmem:[#allocation2 + $0x2] sm:$0xff]  ;;  %v883_v21 = vld [vmem:[#allocation2 + $0xa] sm:$0xff] }
  0x22   : > { %371 = vst.msk [vmem:[#allocation2 + $0x130] sm:$0x3] %vm334_vm2, %v4262_v1  ;;  %374 = vst.msk [vmem:[#allocation2 + $0x148] sm:$0x3] %vm334_vm2, %v4262_v1  ;;  %1267 = vrot.lane.b32.xlu1 %v882_v19, %s4264_s29  ;;  %v403_v22 = vld [vmem:[%s4438_s27 + $0x80] sm:$0xff]  ;;  %v404_v23 = vld [vmem:[%s4438_s27 + $0x88] sm:$0xff] }
  0x23   : > { %372 = vst.msk [vmem:[#allocation2 + $0x138] sm:$0xff] %vm331_vm1, %v4262_v1  ;;  %373 = vst.msk [vmem:[#allocation2 + $0x140] sm:$0xff] %vm331_vm1, %v4262_v1  ;;  %3798 = vmatmul.mubr.msk.f32.gmra.mrb[4].mxu1 %vm427_vm3, %v392_v7  ;;  %v405_v24 = vld [vmem:[%s4438_s27 + $0x90] sm:$0xff]  ;;  %v406_v25 = vld [vmem:[%s4438_s27 + $0x98] sm:$0xff] }
  0x24   : > { %375 = vst.msk [vmem:[#allocation2 + $0x150] sm:$0xff] %vm331_vm1, %v4262_v1  ;;  %376 = vst.msk [vmem:[#allocation2 + $0x158] sm:$0xff] %vm331_vm1, %v4262_v1  ;;  %3800 = vmatprep.mubr.msk.f32.mxu1 %vm427_vm3, %v393_v8  ;;  %v407_v26 = vld [vmem:[%s4438_s27 + $0xa0] sm:$0xff]  ;;  %v408_v27 = vld [vmem:[%s4438_s27 + $0xa8] sm:$0xff] }
  0x25   : > { %377 = vst.msk [vmem:[#allocation2 + $0x160] sm:$0x3] %vm334_vm2, %v4262_v1  ;;  %380 = vst.msk [vmem:[#allocation2 + $0x178] sm:$0x3] %vm334_vm2, %v4262_v1  ;;  %v409_v28 = vld [vmem:[%s4438_s27 + $0xb0] sm:$0xff]  ;;  %v410_v29 = vld [vmem:[%s4438_s27 + $0xb8] sm:$0xff] }
  0x26   : > { %378 = vst.msk [vmem:[#allocation2 + $0x168] sm:$0xff] %vm331_vm1, %v4262_v1  ;;  %379 = vst.msk [vmem:[#allocation2 + $0x170] sm:$0xff] %vm331_vm1, %v4262_v1  ;;  %1269 = vrot.lane.b32.xlu1 %v883_v21, %s4264_s29  ;;  %v2394_v7 = vld [vmem:[%s5905_s3] sm:$0xff]  ;;  %v2395_v8 = vld [vmem:[%s5905_s3 + $0x8] sm:$0xff] }
  0x27   : > { %381 = vst.msk [vmem:[#allocation2 + $0x180] sm:$0xff] %vm331_vm1, %v4262_v1  ;;  %382 = vst.msk [vmem:[#allocation2 + $0x188] sm:$0xff] %vm331_vm1, %v4262_v1  ;;  %3801 = vmatmul.mubr.msk.f32.gmra.mrb[6].mxu1 %vm427_vm3, %v394_v9  ;;  %v413_v18 = vld [vmem:[%s4438_s27 + $0xd0] sm:$0xff]  ;;  %v414_v19 = vld [vmem:[%s4438_s27 + $0xd8] sm:$0xff] }
  0x28   : > { %383 = vst.msk [vmem:[#allocation2 + $0x190] sm:$0x3] %vm334_vm2, %v4262_v1  ;;  %386 = vst.msk [vmem:[#allocation2 + $0x1a8] sm:$0x3] %vm334_vm2, %v4262_v1  ;;  %3803 = vmatprep.mubr.msk.f32.mxu1 %vm427_vm3, %v395_v10  ;;  %v4005_v10 = vpack.c.bf16 %v2395_v8, %v2394_v7  ;;  %v2398_v20 = vld [vmem:[%s5905_s3 + $0x20] sm:$0xff]  ;;  %v2399_v21 = vld [vmem:[%s5905_s3 + $0x28] sm:$0xff] }
  0x29   : > { %384 = vst.msk [vmem:[#allocation2 + $0x198] sm:$0xff] %vm331_vm1, %v4262_v1  ;;  %385 = vst.msk [vmem:[#allocation2 + $0x1a0] sm:$0xff] %vm331_vm1, %v4262_v1 }
  0x2a   : > { %4006 = vmatprep.subr.bf16.mxu1 %v4005_v10 }
  0x2b   : > { %3804 = vmatmul.mubr.msk.f32.gmra.mrb[8].mxu1 %vm427_vm3, %v396_v11  ;;  %v411_v11 = vld [vmem:[%s4438_s27 + $0xc0] sm:$0xff] }
  0x2c   : > { %3806 = vmatprep.mubr.msk.f32.mxu1 %vm427_vm3, %v397_v12  ;;  %v412_v12 = vld [vmem:[%s4438_s27 + $0xc8] sm:$0xff]  ;;  %4008 = vmatpush3.bf16.msra.mxu1 %v4005_v10 }
  0x2f   : > { %3807 = vmatmul.mubr.msk.f32.gmra.mrb[10].mxu1 %vm427_vm3, %v398_v13 }
  0x30   : > { %3809 = vmatprep.mubr.msk.f32.mxu1 %vm427_vm3, %v399_v14  ;;  %v2396_v14 = vld [vmem:[%s5905_s3 + $0x10] sm:$0xff] }
  0x33   : > { %3810 = vmatmul.mubr.msk.f32.gmra.mrb[12].mxu1 %vm427_vm3, %v400_v15  ;;  %v2397_v15 = vld [vmem:[%s5905_s3 + $0x18] sm:$0xff] }
  0x34   : > { %3812 = vmatprep.mubr.msk.f32.mxu1 %vm427_vm3, %v401_v16 }
  0x37   : > { %3813 = vmatmul.mubr.msk.f32.gmra.mrb[14].mxu1 %vm427_vm3, %v402_v17  ;;  %v4009_v17 = vpack.c.bf16 %v2397_v15, %v2396_v14 }
  0x38   : > { %3815 = vmatprep.mubr.msk.f32.mxu1 %vm427_vm3, %v403_v22  ;;  %v4013_v22 = vpack.c.bf16 %v2399_v21, %v2398_v20 }
  0x39   : > { %4010 = vmatprep.subr.bf16.mxu1 %v4009_v17 }
  0x3a   : > { %4012 = vmatpush3.bf16.msra.mxu1 %v4009_v17 }
  0x3b   : > { %3816 = vmatmul.mubr.msk.f32.gmra.mrb[16].mxu1 %vm427_vm3, %v404_v23  ;;  %4014 = vmatprep.subr.bf16.mxu1 %v4013_v22 }
  0x3c   : > { %3818 = vmatprep.mubr.msk.f32.mxu1 %vm427_vm3, %v405_v24  ;;  %v415_v24 = vld [vmem:[%s4438_s27 + $0xe0] sm:$0xff] }
  0x3e   : > { %4016 = vmatpush3.bf16.msra.mxu1 %v4013_v22 }
  0x3f   : > { %3819 = vmatmul.mubr.msk.f32.gmra.mrb[18].mxu1 %vm427_vm3, %v406_v25  ;;  %v416_v25 = vld [vmem:[%s4438_s27 + $0xe8] sm:$0xff] }
  0x40   : > { %3821 = vmatprep.mubr.msk.f32.mxu1 %vm427_vm3, %v407_v26  ;;  %v2400_v26 = vld [vmem:[%s5905_s3 + $0x30] sm:$0xff] }
  0x43   : > { %3822 = vmatmul.mubr.msk.f32.gmra.mrb[20].mxu1 %vm427_vm3, %v408_v27  ;;  %v2401_v27 = vld [vmem:[%s5905_s3 + $0x38] sm:$0xff] }
  0x44   : > { %3824 = vmatprep.mubr.msk.f32.mxu1 %vm427_vm3, %v409_v28  ;;  %v4017_v28 = vpack.c.bf16 %v2401_v27, %v2400_v26 }
  0x46   : > { %4018 = vmatprep.subr.bf16.mxu1 %v4017_v28 }
  0x47   : > { %3825 = vmatmul.mubr.msk.f32.gmra.mrb[22].mxu1 %vm427_vm3, %v410_v29 }
  0x48   : > { %3827 = vmatprep.mubr.msk.f32.mxu1 %vm427_vm3, %v411_v11  ;;  %4020 = vmatpush3.bf16.msra.mxu1 %v4017_v28 }
  0x4b   : > { %3828 = vmatmul.mubr.msk.f32.gmra.mrb[24].mxu1 %vm427_vm3, %v412_v12 }
  0x4c   : > { %3830 = vmatprep.mubr.msk.f32.mxu1 %vm427_vm3, %v413_v18 }
  0x4f   : > { %3831 = vmatmul.mubr.msk.f32.gmra.mrb[26].mxu1 %vm427_vm3, %v414_v19 }
  0x50   : > { %3833 = vmatprep.mubr.msk.f32.mxu1 %vm427_vm3, %v415_v24 }
  0x53   : > { %3834 = vmatmul.mubr.msk.f32.gmra.mrb[28].mxu1 %vm427_vm3, %v416_v25 }
  0xee   : > { %v3793_v31 = vpop.f32.mrb[0].mxu1 }
  0xef   : > { %v600_v32 = vadd.f32 %v3793_v31, %v4495_v30  ;;  %v594_v33 = vpop.f32.mrb[1].mxu1  ;;  %v417_v31 = vld [vmem:[%s4438_s27 + $0xf0] sm:$0xff] }
  0xf0   : > { %v595_v34 = vadd.f32 %v4495_v30, %v594_v33  ;;  %3836 = vmatprep.mubr.msk.f32.mxu1 %vm427_vm3, %v417_v31  ;;  %v2402_v33 = vld [vmem:[%s5905_s3 + $0x40] sm:$0xff] }
  0xf1   : > { %v754_v35 = vmax.f32 %v600_v32, 0.0  ;;  %v418_v32 = vld [vmem:[%s4438_s27 + $0xf8] sm:$0xff]  ;;  %3855 = vmatprep.subr.mxu1 %v2402_v33 }
  0xf2   : > { %v753_v36 = vmax.f32 %v595_v34, 0.0  ;;  %v3796_v37 = vpop.f32.mrb[2].mxu1  ;;  %3837 = vmatmul.mubr.msk.f32.gmra.mrb[30].mxu1 %vm427_vm3, %v418_v32 }
  0xf3   : > { %787 = vst.msk [vmem:[#allocation2 + $0x21] sm:$0xff] %vm331_vm1, %v754_v35  ;;  %v610_v38 = vadd.f32 %v3796_v37, %v4495_v30  ;;  %v604_v39 = vpop.f32.mrb[3].mxu1  ;;  %3856 = vmatpush3.msra.mxu1 %v2402_v33 }
  0xf4   : > { %786 = vst.msk [vmem:[#allocation2 + $0x19] sm:$0xff] %vm331_vm1, %v753_v36  ;;  %v605_v40 = vadd.f32 %v4495_v30, %v604_v39 }
  0xf5   : > { %v756_v41 = vmax.f32 %v610_v38, 0.0 }
  0xf6   : > { %v755_v42 = vmax.f32 %v605_v40, 0.0  ;;  %v3799_v43 = vpop.f32.mrb[4].mxu1 }
  0xf7   : > { %789 = vst.msk [vmem:[#allocation2 + $0x39] sm:$0xff] %vm331_vm1, %v756_v41  ;;  %v620_v44 = vadd.f32 %v3799_v43, %v4495_v30  ;;  %v614_v45 = vpop.f32.mrb[5].mxu1 }
  0xf8   : > { %788 = vst.msk [vmem:[#allocation2 + $0x31] sm:$0xff] %vm331_vm1, %v755_v42  ;;  %v615_v46 = vadd.f32 %v4495_v30, %v614_v45 }
  0xf9   : > { %v758_v47 = vmax.f32 %v620_v44, 0.0 }
  0xfa   : > { %v947_v48 = vld [vmem:[#allocation2 + $0x21] sm:$0xff]  ;;  %v757_v49 = vmax.f32 %v615_v46, 0.0  ;;  %v3802_v50 = vpop.f32.mrb[6].mxu1 }
  0xfb   : > { %1525 = vrot.lane.b32.xlu0 %v947_v48, %s4265_s17  ;;  %v4508_v51 = vld [vmem:[#allocation2 + $0x20] sm:$0xff]  ;;  %791 = vst.msk [vmem:[#allocation2 + $0x51] sm:$0xff] %vm331_vm1, %v758_v47  ;;  %v630_v52 = vadd.f32 %v3802_v50, %v4495_v30  ;;  %v624_v53 = vpop.f32.mrb[7].mxu1  ;;  %v4547_v16 = vld [vmem:[#allocation2 + $0x18] sm:$0xff] }
  0xfc   : > { %1397 = vrot.lane.b32.xlu1 %v4508_v51, %s4266_s21  ;;  %790 = vst.msk [vmem:[#allocation2 + $0x49] sm:$0xff] %vm331_vm1, %v757_v49  ;;  %v625_v54 = vadd.f32 %v4495_v30, %v624_v53  ;;  %v852_v58 = vld [vmem:[#allocation2 + $0x19] sm:$0xff]  ;;  %v979_v63 = vld [vmem:[#allocation2 + $0x22] sm:$0xff] }
  0xfd   : > { %v760_v55 = vmax.f32 %v630_v52, 0.0  ;;  %v978_v2 = vld [vmem:[#allocation2 + $0x1a] sm:$0xff] }
  0xfe   : > { %v759_v56 = vmax.f32 %v625_v54, 0.0  ;;  %v3805_v57 = vpop.f32.mrb[8].mxu1  ;;  %v949_v13 = vld [vmem:[#allocation2 + $0x39] sm:$0xff] }
  0xff   : > { %1145 = vrot.lane.b32.xlu0 %v947_v48, %s4263_s28  ;;  %793 = vst.msk [vmem:[#allocation2 + $0x69] sm:$0xff] %vm331_vm1, %v760_v55  ;;  %v640_v59 = vadd.f32 %v3805_v57, %v4495_v30  ;;  %v634_v60 = vpop.f32.mrb[9].mxu1  ;;  %v1076_v23 = vld [vmem:[#allocation2 + $0x3a] sm:$0xff]  ;;  %v4576_v29 = vld [vmem:[#allocation2 + $0x30] sm:$0xff] }
 0x100   : > { %1143 = vrot.lane.b32.xlu1 %v852_v58, %s4263_s28  ;;  %792 = vst.msk [vmem:[#allocation2 + $0x61] sm:$0xff] %vm331_vm1, %v759_v56  ;;  %v635_v61 = vadd.f32 %v4495_v30, %v634_v60  ;;  %v1043_v34 = vld [vmem:[#allocation2 + $0x31] sm:$0xff] }
 0x101   : > { %v762_v62 = vmax.f32 %v640_v59, 0.0  ;;  %v4596_v40 = vld [vmem:[#allocation2 + $0x38] sm:$0xff] }
 0x102   : > { %v761_v0 = vmax.f32 %v635_v61, 0.0  ;;  %v3808_v1 = vpop.f32.mrb[10].mxu1  ;;  %v1075_v42 = vld [vmem:[#allocation2 + $0x32] sm:$0xff] }
 0x103   : > { %1653 = vrot.lane.b32.xlu0 %v979_v63, %s4267_s22  ;;  %795 = vst.msk [vmem:[#allocation2 + $0x81] sm:$0xff] %vm331_vm1, %v762_v62  ;;  %v650_v3 = vadd.f32 %v3808_v1, %v4495_v30  ;;  %v644_v4 = vpop.f32.mrb[11].mxu1  ;;  %v951_v43 = vld [vmem:[#allocation2 + $0x51] sm:$0xff]  ;;  %v4611_v45 = vld [vmem:[#allocation2 + $0x48] sm:$0xff]  ;;  %v4652_v1 = vpop.permute.xlu0 %1139 }
 0x104   : > { %1651 = vrot.lane.b32.xlu1 %v978_v2, %s4267_s22  ;;  %794 = vst.msk [vmem:[#allocation2 + $0x79] sm:$0xff] %vm331_vm1, %v761_v0  ;;  %v645_v5 = vadd.f32 %v4495_v30, %v644_v4  ;;  %v1078_v44 = vld [vmem:[#allocation2 + $0x52] sm:$0xff]  ;;  %v1045_v46 = vld [vmem:[#allocation2 + $0x49] sm:$0xff]  ;;  %v4656_v4 = vpop.permute.xlu1 %1267 }
 0x105   : > { %v764_v6 = vmax.f32 %v650_v3, 0.0  ;;  %v4624_v53 = vld [vmem:[#allocation2 + $0x50] sm:$0xff] }
 0x106   : > { %v763_v9 = vmax.f32 %v645_v5, 0.0  ;;  %v3811_v35 = vpop.f32.mrb[12].mxu1  ;;  %v1077_v55 = vld [vmem:[#allocation2 + $0x4a] sm:$0xff] }
 0x107   : > { %1273 = vrot.lane.b32.xlu0 %v979_v63, %s4264_s29  ;;  %797 = vst.msk [vmem:[#allocation2 + $0x99] sm:$0xff] %vm331_vm1, %v764_v6  ;;  %v660_v36 = vadd.f32 %v3811_v35, %v4495_v30  ;;  %v654_v37 = vpop.f32.mrb[13].mxu1  ;;  %v953_v56 = vld [vmem:[#allocation2 + $0x69] sm:$0xff]  ;;  %v1047_v59 = vld [vmem:[#allocation2 + $0x61] sm:$0xff]  ;;  %v1142_v6 = vpop.permute.xlu0 %1141 }
 0x108   : > { %1271 = vrot.lane.b32.xlu1 %v978_v2, %s4264_s29  ;;  %796 = vst.msk [vmem:[#allocation2 + $0x91] sm:$0xff] %vm331_vm1, %v763_v9  ;;  %v655_v38 = vadd.f32 %v4495_v30, %v654_v37  ;;  %v1080_v57 = vld [vmem:[#allocation2 + $0x6a] sm:$0xff]  ;;  %v1079_v5 = vld [vmem:[#allocation2 + $0x62] sm:$0xff]  ;;  %v1270_v7 = vpop.permute.xlu1 %1269 }
 0x109   : > { %v766_v39 = vmax.f32 %v660_v36, 0.0  ;;  %v4654_v3 = vld [vmem:[#allocation2 + $0x68] sm:$0xff]  ;;  %v818_v37 = vld [vmem:[#allocation2] sm:$0xff] }
 0x10a   : > { %v765_v41 = vmax.f32 %v655_v38, 0.0  ;;  %v3814_v47 = vpop.f32.mrb[14].mxu1  ;;  %v955_v8 = vld [vmem:[#allocation2 + $0x81] sm:$0xff] }
 0x10b   : > { %1395 = vrot.lane.b32.xlu0 %v4547_v16, %s4266_s21  ;;  %799 = vst.msk [vmem:[#allocation2 + $0xb1] sm:$0xff] %vm331_vm1, %v766_v39  ;;  %v670_v48 = vadd.f32 %v3814_v47, %v4495_v30  ;;  %v664_v49 = vpop.f32.mrb[15].mxu1  ;;  %v1082_v11 = vld [vmem:[#allocation2 + $0x82] sm:$0xff]  ;;  %v4677_v14 = vld [vmem:[#allocation2 + $0x78] sm:$0xff] }
 0x10c   : > { %1529 = vrot.lane.b32.xlu1 %v949_v13, %s4265_s17  ;;  %798 = vst.msk [vmem:[#allocation2 + $0xa9] sm:$0xff] %vm331_vm1, %v765_v41  ;;  %v665_v50 = vadd.f32 %v4495_v30, %v664_v49  ;;  %v1049_v20 = vld [vmem:[#allocation2 + $0x79] sm:$0xff]  ;;  %v819_v41 = vld [vmem:[#allocation2 + $0x8] sm:$0xff] }
 0x10d   : > { %v768_v52 = vmax.f32 %v670_v48, 0.0  ;;  %v4698_v33 = vld [vmem:[#allocation2 + $0x80] sm:$0xff] }
 0x10e   : > { %v767_v54 = vmax.f32 %v665_v50, 0.0  ;;  %v3817_v60 = vpop.f32.mrb[16].mxu1  ;;  %v957_v39 = vld [vmem:[#allocation2 + $0x99] sm:$0xff] }
 0x10f   : > { %1523 = vrot.lane.b32.xlu0 %v852_v58, %s4265_s17  ;;  %801 = vst.msk [vmem:[#allocation2 + $0xc9] sm:$0xff] %vm331_vm1, %v768_v52  ;;  %v4639_v58 = vld [vmem:[#allocation2 + $0x60] sm:$0xff]  ;;  %v680_v61 = vadd.f32 %v3817_v60, %v4495_v30  ;;  %v674_v62 = vpop.f32.mrb[17].mxu1 }
 0x110   : > { %2037 = vrot.lane.b32.xlu1 %v1076_v23, %s5912_s23  ;;  %s4270_s23 = smov 48   ;;  %800 = vst.msk [vmem:[#allocation2 + $0xc1] sm:$0xff] %vm331_vm1, %v767_v54  ;;  %v675_v63 = vadd.f32 %v4495_v30, %v674_v62  ;;  %v1084_v49 = vld [vmem:[#allocation2 + $0x9a] sm:$0xff] }
 0x111   : > { %v770_v0 = vmax.f32 %v680_v61, 0.0 }
 0x112   : > { %v769_v2 = vmax.f32 %v675_v63, 0.0  ;;  %v3820_v22 = vpop.f32.mrb[18].mxu1 }
 0x113   : > { %1909 = vrot.lane.b32.xlu0 %v949_v13, %s4269_s16  ;;  %803 = vst.msk [vmem:[#allocation2 + $0xe1] sm:$0xff] %vm331_vm1, %v770_v0  ;;  %v690_v24 = vadd.f32 %v3820_v22, %v4495_v30  ;;  %v684_v25 = vpop.f32.mrb[19].mxu1 }
 0x114   : > { %1779 = vrot.lane.b32.xlu1 %v4576_v29, %s4270_s23  ;;  %802 = vst.msk [vmem:[#allocation2 + $0xd9] sm:$0xff] %vm331_vm1, %v769_v2  ;;  %v685_v26 = vadd.f32 %v4495_v30, %v684_v25 }
 0x115   : > { %v772_v27 = vmax.f32 %v690_v24, 0.0 }
 0x116   : > { %v771_v31 = vmax.f32 %v685_v26, 0.0 }
 0x117   : > { %1149 = vrot.lane.b32.xlu0 %v949_v13, %s4263_s28  ;;  %805 = vst.msk [vmem:[#allocation2 + $0xf9] sm:$0xff] %vm331_vm1, %v772_v27 }
 0x118   : > { %1399 = vrot.lane.b32.xlu1 %v4576_v29, %s4266_s21  ;;  %804 = vst.msk [vmem:[#allocation2 + $0xf1] sm:$0xff] %vm331_vm1, %v771_v31  ;;  %v1083_v31 = vld [vmem:[#allocation2 + $0x92] sm:$0xff] }
 0x11b   : > { %1657 = vrot.lane.b32.xlu0 %v1076_v23, %s4267_s22 }
 0x11c   : > { %1907 = vrot.lane.b32.xlu1 %v1043_v34, %s4269_s16 }
 0x11f   : > { %1277 = vrot.lane.b32.xlu0 %v1076_v23, %s4264_s29 }
 0x120   : > { %1527 = vrot.lane.b32.xlu1 %v1043_v34, %s4265_s17 }
 0x123   : > { %1781 = vrot.lane.b32.xlu0 %v4596_v40, %s4270_s23 }
 0x124   : > { %2035 = vrot.lane.b32.xlu1 %v1075_v42, %s5916_s26 }
 0x127   : > { %1401 = vrot.lane.b32.xlu0 %v4596_v40, %s4266_s21 }
 0x128   : > { %1275 = vrot.lane.b32.xlu1 %v1075_v42, %s4264_s29 }
 0x12b   : > { %1147 = vrot.lane.b32.xlu0 %v1043_v34, %s4263_s28  ;;  %v1081_v34 = vld [vmem:[#allocation2 + $0x7a] sm:$0xff] }
 0x12c   : > { %1533 = vrot.lane.b32.xlu1 %v951_v43, %s4265_s17 }
 0x12f   : > { %1655 = vrot.lane.b32.xlu0 %v1075_v42, %s4267_s22 }
 0x130   : > { %2041 = vrot.lane.b32.xlu1 %v1078_v44, %s5916_s26 }
 0x133   : > { %1913 = vrot.lane.b32.xlu0 %v951_v43, %s4269_s16 }
 0x134   : > { %1783 = vrot.lane.b32.xlu1 %v4611_v45, %s4270_s23 }
 0x137   : > { %1153 = vrot.lane.b32.xlu0 %v951_v43, %s4263_s28  ;;  %v2131_v43 = vsel %vm331_vm1, %v818_v37, %v4652_v1 }
 0x138   : > { %1403 = vrot.lane.b32.xlu1 %v4611_v45, %s4266_s21  ;;  %v2164_v48 = vsel %vm2163_vm4, %v2131_v43, %v4656_v4 }
 0x13b   : > { %1661 = vrot.lane.b32.xlu0 %v1078_v44, %s4267_s22 }
 0x13c   : > { %1911 = vrot.lane.b32.xlu1 %v1045_v46, %s4269_s16 }
 0x13f   : > { %1281 = vrot.lane.b32.xlu0 %v1078_v44, %s4264_s29  ;;  %v2132_v44 = vsel %vm331_vm1, %v819_v41, %v1142_v6 }
 0x140   : > { %1531 = vrot.lane.b32.xlu1 %v1045_v46, %s4265_s17  ;;  %v2165_v50 = vsel %vm2163_vm4, %v2132_v44, %v1270_v7 }
 0x143   : > { %1785 = vrot.lane.b32.xlu0 %v4624_v53, %s4270_s23 }
 0x144   : > { %2039 = vrot.lane.b32.xlu1 %v1077_v55, %s5916_s26 }
 0x147   : > { %1405 = vrot.lane.b32.xlu0 %v4624_v53, %s4266_s21 }
 0x148   : > { %1279 = vrot.lane.b32.xlu1 %v1077_v55, %s4264_s29 }
 0x14b   : > { %1151 = vrot.lane.b32.xlu0 %v1045_v46, %s4263_s28 }
 0x14c   : > { %1537 = vrot.lane.b32.xlu1 %v953_v56, %s4265_s17 }
 0x14f   : > { %1659 = vrot.lane.b32.xlu0 %v1077_v55, %s4267_s22 }
 0x150   : > { %2045 = vrot.lane.b32.xlu1 %v1080_v57, %s5916_s26 }
 0x153   : > { %1917 = vrot.lane.b32.xlu0 %v953_v56, %s4269_s16 }
 0x154   : > { %1787 = vrot.lane.b32.xlu1 %v4639_v58, %s4270_s23 }
 0x157   : > { %1157 = vrot.lane.b32.xlu0 %v953_v56, %s4263_s28 }
 0x158   : > { %1407 = vrot.lane.b32.xlu1 %v4639_v58, %s4266_s21 }
 0x15b   : > { %1665 = vrot.lane.b32.xlu0 %v1080_v57, %s4267_s22 }
 0x15c   : > { %1915 = vrot.lane.b32.xlu1 %v1047_v59, %s4269_s16 }
 0x15f   : > { %1285 = vrot.lane.b32.xlu0 %v1080_v57, %s4264_s29 }
 0x160   : > { %1535 = vrot.lane.b32.xlu1 %v1047_v59, %s4265_s17 }
 0x163   : > { %1789 = vrot.lane.b32.xlu0 %v4654_v3, %s4270_s23 }
 0x164   : > { %2043 = vrot.lane.b32.xlu1 %v1079_v5, %s5916_s26 }
 0x167   : > { %1409 = vrot.lane.b32.xlu0 %v4654_v3, %s4266_s21 }
 0x168   : > { %1283 = vrot.lane.b32.xlu1 %v1079_v5, %s4264_s29 }
 0x16b   : > { %1155 = vrot.lane.b32.xlu0 %v1047_v59, %s4263_s28  ;;  %v4732_v59 = vld [vmem:[#allocation2 + $0x90] sm:$0xff] }
 0x16c   : > { %1541 = vrot.lane.b32.xlu1 %v955_v8, %s4265_s17 }
 0x16d   : > { %v4668_v9 = vpop.permute.xlu0 %1525 }
 0x16e   : > { %v1398_v10 = vpop.permute.xlu1 %1397 }
 0x16f   : > { %1663 = vrot.lane.b32.xlu0 %v1079_v5, %s4267_s22  ;;  %v2198_v54 = vsel %vm2196_vm5, %v2165_v50, %v1398_v10  ;;  %v1051_v10 = vld [vmem:[#allocation2 + $0x91] sm:$0xff] }
 0x170   : > { %2049 = vrot.lane.b32.xlu1 %v1082_v11, %s5916_s26  ;;  %v2231_v60 = vsel %vm2229_vm6, %v2198_v54, %v4668_v9 }
 0x171   : > { %v4672_v12 = vpop.permute.xlu0 %1145 }
 0x172   : > { %v4674_v13 = vpop.permute.xlu1 %1143 }
 0x173   : > { %1921 = vrot.lane.b32.xlu0 %v955_v8, %s4269_s16 }
 0x174   : > { %1791 = vrot.lane.b32.xlu1 %v4677_v14, %s4270_s23 }
 0x175   : > { %v4681_v15 = vpop.permute.xlu0 %1653 }
 0x176   : > { %v1652_v17 = vpop.permute.xlu1 %1651  ;;  %v2264_v62 = vsel %vm2262_vm7, %v2231_v60, %v4681_v15  ;;  %v3823_v15 = vpop.f32.mrb[20].mxu1 }
 0x177   : > { %1161 = vrot.lane.b32.xlu0 %v955_v8, %s4263_s28 }
 0x178   : > { %1411 = vrot.lane.b32.xlu1 %v4677_v14, %s4266_s21 }
 0x179   : > { %v4686_v18 = vpop.permute.xlu0 %1273 }
 0x17a   : > { %v4688_v19 = vpop.permute.xlu1 %1271 }
 0x17b   : > { %1669 = vrot.lane.b32.xlu0 %v1082_v11, %s4267_s22 }
 0x17c   : > { %1919 = vrot.lane.b32.xlu1 %v1049_v20, %s4269_s16 }
 0x17d   : > { %v1396_v21 = vpop.permute.xlu0 %1395 }
 0x17e   : > { %v4692_v23 = vpop.permute.xlu1 %1529  ;;  %v2197_v52 = vsel %vm2196_vm5, %v2164_v48, %v1396_v21  ;;  %v694_v21 = vpop.f32.mrb[21].mxu1  ;;  %v1086_v48 = vld [vmem:[#allocation2 + $0xb2] sm:$0xff] }
 0x17f   : > { %1289 = vrot.lane.b32.xlu0 %v1082_v11, %s4264_s29  ;;  %v695_v22 = vadd.f32 %v4495_v30, %v694_v21 }
 0x180   : > { %1539 = vrot.lane.b32.xlu1 %v1049_v20, %s4265_s17 }
 0x181   : > { %v1524_v28 = vpop.permute.xlu0 %1523  ;;  %v773_v26 = vmax.f32 %v695_v22, 0.0  ;;  %v4836_v22 = vld [vmem:[#allocation2 + $0xb0] sm:$0xff] }
 0x182   : > { %v2038_v32 = vpop.permute.xlu1 %2037  ;;  %v2230_v55 = vsel %vm2229_vm6, %v2197_v52, %v1524_v28  ;;  %v4764_v28 = vld [vmem:[#allocation2 + $0x98] sm:$0xff] }
 0x183   : > { %1793 = vrot.lane.b32.xlu0 %v4698_v33, %s4270_s23  ;;  %v2263_v61 = vsel %vm2262_vm7, %v2230_v55, %v1652_v17  ;;  %806 = vst.msk [vmem:[#allocation2 + $0x109] sm:$0xff] %vm331_vm1, %v773_v26 }
 0x184   : > { %2047 = vrot.lane.b32.xlu1 %v1081_v34, %s5916_s26 }
 0x185   : > { %v1910_v35 = vpop.permute.xlu0 %1909 }
 0x186   : > { %v1780_v36 = vpop.permute.xlu1 %1779 }
 0x187   : > { %1413 = vrot.lane.b32.xlu0 %v4698_v33, %s4266_s21  ;;  %v2296_v63 = vsel %vm2295_vm8, %v2263_v61, %v1780_v36  ;;  %v959_v36 = vld [vmem:[#allocation2 + $0xb1] sm:$0xff] }
 0x188   : > { %1287 = vrot.lane.b32.xlu1 %v1081_v34, %s4264_s29 }
 0x189   : > { %v4708_v38 = vpop.permute.xlu0 %1149 }
 0x18a   : > { %v4710_v42 = vpop.permute.xlu1 %1399 }
 0x18b   : > { %1159 = vrot.lane.b32.xlu0 %v1049_v20, %s4263_s28  ;;  %v700_v20 = vadd.f32 %v3823_v15, %v4495_v30 }
 0x18c   : > { %1545 = vrot.lane.b32.xlu1 %v957_v39, %s4265_s17 }
 0x18d   : > { %v4717_v46 = vpop.permute.xlu0 %1657  ;;  %v774_v24 = vmax.f32 %v700_v20, 0.0 }
 0x18e   : > { %v1908_v47 = vpop.permute.xlu1 %1907 }
 0x18f   : > { %1667 = vrot.lane.b32.xlu0 %v1081_v34, %s4267_s22  ;;  %v2329_v1 = vsel %vm2328_vm9, %v2296_v63, %v1908_v47  ;;  %807 = vst.msk [vmem:[#allocation2 + $0x111] sm:$0xff] %vm331_vm1, %v774_v24  ;;  %v1085_v24 = vld [vmem:[#allocation2 + $0xaa] sm:$0xff] }
 0x190   : > { %2053 = vrot.lane.b32.xlu1 %v1084_v49, %s5916_s26 }
 0x191   : > { %v4727_v56 = vpop.permute.xlu0 %1277 }
 0x192   : > { %v4729_v57 = vpop.permute.xlu1 %1527 }
 0x193   : > { %1925 = vrot.lane.b32.xlu0 %v957_v39, %s4269_s16 }
 0x194   : > { %1795 = vrot.lane.b32.xlu1 %v4732_v59, %s4270_s23 }
 0x195   : > { %v1782_v0 = vpop.permute.xlu0 %1781 }
 0x196   : > { %v2297_v2 = vsel %vm2295_vm8, %v2264_v62, %v1782_v0  ;;  %v2036_v4 = vpop.permute.xlu1 %2035 }
 0x197   : > { %v2330_v5 = vsel %vm2328_vm9, %v2297_v2, %v1910_v35  ;;  %v2362_v6 = vsel %vm2361_vm10, %v2329_v1, %v2036_v4  ;;  %1165 = vrot.lane.b32.xlu0 %v957_v39, %s4263_s28  ;;  %v2134_v39 = vsel %vm331_vm1, %v4508_v51, %v4672_v12  ;;  %v1053_v1 = vld [vmem:[#allocation2 + $0xa9] sm:$0xff]  ;;  %v3826_v4 = vpop.f32.mrb[22].mxu1 }
 0x198   : > { %v2363_v7 = vsel %vm2361_vm10, %v2330_v5, %v2038_v32  ;;  %1415 = vrot.lane.b32.xlu1 %v4732_v59, %s4266_s21  ;;  %3857 = vmatprep.mubr.msk.f32.mxu1 %vm2410_vm11, %v2362_v6  ;;  %v2167_v43 = vsel %vm2163_vm4, %v2134_v39, %v4686_v18  ;;  %v710_v6 = vadd.f32 %v3826_v4, %v4495_v30 }
 0x199   : > { %v1402_v8 = vpop.permute.xlu0 %1401  ;;  %3858 = vmatmul.mubr.msk.f32.vlgmr.msra.gmra.mrb[32].mxu1 %vm2410_vm11, %v2363_v7  ;;  %v704_v7 = vpop.f32.mrb[23].mxu1 }
 0x19a   : > { %v4752_v9 = vpop.permute.xlu1 %1275  ;;  %v2200_v47 = vsel %vm2196_vm5, %v2167_v43, %v1402_v8  ;;  %v705_v8 = vadd.f32 %v4495_v30, %v704_v7 }
 0x19b   : > { %1673 = vrot.lane.b32.xlu0 %v1084_v49, %s4267_s22  ;;  %v2233_v50 = vsel %vm2229_vm6, %v2200_v47, %v4692_v23 }
 0x19c   : > { %1923 = vrot.lane.b32.xlu1 %v1051_v10, %s4269_s16  ;;  %v2266_v23 = vsel %vm2262_vm7, %v2233_v50, %v4717_v46  ;;  %v775_v20 = vmax.f32 %v705_v8, 0.0  ;;  %v4912_v8 = vld [vmem:[#allocation2 + $0xc8] sm:$0xff] }
 0x19d   : > { %v4756_v11 = vpop.permute.xlu0 %1147 }
 0x19e   : > { %v4758_v17 = vpop.permute.xlu1 %1533  ;;  %808 = vst.msk [vmem:[#allocation2 + $0x121] sm:$0xff] %vm331_vm1, %v775_v20  ;;  %v2135_v43 = vsel %vm331_vm1, %v4576_v29, %v4756_v11 }
 0x19f   : > { %1293 = vrot.lane.b32.xlu0 %v1084_v49, %s4264_s29  ;;  %v2133_v49 = vsel %vm331_vm1, %v4547_v16, %v4674_v13  ;;  %v4806_v16 = vld [vmem:[#allocation2 + $0xa8] sm:$0xff] }
 0x1a0   : > { %1543 = vrot.lane.b32.xlu1 %v1051_v10, %s4265_s17  ;;  %v2166_v51 = vsel %vm2163_vm4, %v2133_v49, %v4688_v19 }
 0x1a1   : > { %v1656_v25 = vpop.permute.xlu0 %1655  ;;  %v2199_v18 = vsel %vm2196_vm5, %v2166_v51, %v4710_v42  ;;  %v4878_v51 = vld [vmem:[#allocation2 + $0xc0] sm:$0xff] }
 0x1a2   : > { %v2042_v27 = vpop.permute.xlu1 %2041  ;;  %v2232_v54 = vsel %vm2229_vm6, %v2199_v18, %v4729_v57 }
 0x1a3   : > { %1797 = vrot.lane.b32.xlu0 %v4764_v28, %s4270_s23  ;;  %v2265_v13 = vsel %vm2262_vm7, %v2232_v54, %v1656_v25 }
 0x1a4   : > { %2051 = vrot.lane.b32.xlu1 %v1083_v31, %s5916_s26 }
 0x1a5   : > { %v1914_v32 = vpop.permute.xlu0 %1913 }
 0x1a6   : > { %v1784_v34 = vpop.permute.xlu1 %1783 }
 0x1a7   : > { %1417 = vrot.lane.b32.xlu0 %v4764_v28, %s4266_s21  ;;  %v2298_v19 = vsel %vm2295_vm8, %v2265_v13, %v1784_v34  ;;  %v2136_v34 = vsel %vm331_vm1, %v4596_v40, %v4708_v38  ;;  %v2168_v40 = vsel %vm2163_vm4, %v2135_v43, %v4752_v9  ;;  %v4928_v43 = vld [vmem:[#allocation2 + $0xd8] sm:$0xff] }
 0x1a8   : > { %1291 = vrot.lane.b32.xlu1 %v1083_v31, %s4264_s29  ;;  %v2169_v39 = vsel %vm2163_vm4, %v2136_v34, %v4727_v56 }
 0x1a9   : > { %v4774_v35 = vpop.permute.xlu0 %1153 }
 0x1aa   : > { %v4776_v37 = vpop.permute.xlu1 %1403 }
 0x1ab   : > { %1163 = vrot.lane.b32.xlu0 %v1051_v10, %s4263_s28  ;;  %v776_v10 = vmax.f32 %v710_v6, 0.0  ;;  %v2201_v56 = vsel %vm2196_vm5, %v2168_v40, %v4776_v37 }
 0x1ac   : > { %1549 = vrot.lane.b32.xlu1 %v959_v36, %s4265_s17 }
 0x1ad   : > { %v4783_v41 = vpop.permute.xlu0 %1661  ;;  %809 = vst.msk [vmem:[#allocation2 + $0x129] sm:$0xff] %vm331_vm1, %v776_v10  ;;  %v1087_v10 = vld [vmem:[#allocation2 + $0xc2] sm:$0xff] }
 0x1ae   : > { %v1912_v44 = vpop.permute.xlu1 %1911 }
 0x1af   : > { %1671 = vrot.lane.b32.xlu0 %v1083_v31, %s4267_s22  ;;  %v2331_v55 = vsel %vm2328_vm9, %v2298_v19, %v1912_v44  ;;  %v961_v31 = vld [vmem:[#allocation2 + $0xc9] sm:$0xff] }
 0x1b0   : > { %2057 = vrot.lane.b32.xlu1 %v1086_v48, %s5916_s26 }
 0x1b1   : > { %v4795_v12 = vpop.permute.xlu0 %1281 }
 0x1b2   : > { %v4801_v52 = vpop.permute.xlu1 %1531 }
 0x1b3   : > { %1929 = vrot.lane.b32.xlu0 %v959_v36, %s4269_s16  ;;  %v2234_v11 = vsel %vm2229_vm6, %v2201_v56, %v4801_v52 }
 0x1b4   : > { %1799 = vrot.lane.b32.xlu1 %v4806_v16, %s4270_s23 }
 0x1b5   : > { %v1786_v42 = vpop.permute.xlu0 %1785 }
 0x1b6   : > { %v2299_v60 = vsel %vm2295_vm8, %v2266_v23, %v1786_v42  ;;  %v2040_v57 = vpop.permute.xlu1 %2039 }
 0x1b7   : > { %v2332_v61 = vsel %vm2328_vm9, %v2299_v60, %v1914_v32  ;;  %v2364_v62 = vsel %vm2361_vm10, %v2331_v55, %v2040_v57  ;;  %1169 = vrot.lane.b32.xlu0 %v959_v36, %s4263_s28  ;;  %v1055_v55 = vld [vmem:[#allocation2 + $0xc1] sm:$0xff]  ;;  %v3829_v57 = vpop.f32.mrb[24].mxu1 }
 0x1b8   : > { %1419 = vrot.lane.b32.xlu1 %v4806_v16, %s4266_s21  ;;  %3860 = vmatprep.mubr.msk.f32.mxu1 %vm2410_vm11, %v2364_v62  ;;  %v2365_v63 = vsel %vm2361_vm10, %v2332_v61, %v2042_v27  ;;  %v720_v62 = vadd.f32 %v3829_v57, %v4495_v30  ;;  %v1058_v57 = vld [vmem:[#allocation2 + $0xe1] sm:$0xff] }
 0x1b9   : > { %v1406_v0 = vpop.permute.xlu0 %1405  ;;  %3861 = vmatmul.mubr.msk.f32.gmra.mrb[34].mxu1 %vm2410_vm11, %v2365_v63  ;;  %v714_v63 = vpop.f32.mrb[25].mxu1 }
 0x1ba   : > { %v4824_v46 = vpop.permute.xlu1 %1279  ;;  %v2202_v47 = vsel %vm2196_vm5, %v2169_v39, %v1406_v0  ;;  %v715_v0 = vadd.f32 %v4495_v30, %v714_v63  ;;  %v3832_v20 = vpop.f32.mrb[26].mxu1  ;;  %v1057_v63 = vld [vmem:[#allocation2 + $0xd9] sm:$0xff] }
 0x1bb   : > { %1677 = vrot.lane.b32.xlu0 %v1086_v48, %s4267_s22  ;;  %v2235_v49 = vsel %vm2229_vm6, %v2202_v47, %v4758_v17 }
 0x1bc   : > { %1927 = vrot.lane.b32.xlu1 %v1053_v1, %s4269_s16  ;;  %v2268_v17 = vsel %vm2262_vm7, %v2235_v49, %v4783_v41  ;;  %v777_v6 = vmax.f32 %v715_v0, 0.0 }
 0x1bd   : > { %v4828_v2 = vpop.permute.xlu0 %1151 }
 0x1be   : > { %v4830_v5 = vpop.permute.xlu1 %1537  ;;  %810 = vst.msk [vmem:[#allocation2 + $0x139] sm:$0xff] %vm331_vm1, %v777_v6 }
 0x1bf   : > { %1297 = vrot.lane.b32.xlu0 %v1086_v48, %s4264_s29  ;;  %v1088_v48 = vld [vmem:[#allocation2 + $0xca] sm:$0xff] }
 0x1c0   : > { %1547 = vrot.lane.b32.xlu1 %v1053_v1, %s4265_s17 }
 0x1c1   : > { %v1660_v15 = vpop.permute.xlu0 %1659 }
 0x1c2   : > { %v2046_v21 = vpop.permute.xlu1 %2045  ;;  %v2267_v18 = vsel %vm2262_vm7, %v2234_v11, %v1660_v15 }
 0x1c3   : > { %1801 = vrot.lane.b32.xlu0 %v4836_v22, %s4270_s23 }
 0x1c4   : > { %2055 = vrot.lane.b32.xlu1 %v1085_v24, %s5916_s26 }
 0x1c5   : > { %v1918_v25 = vpop.permute.xlu0 %1917 }
 0x1c6   : > { %v1788_v26 = vpop.permute.xlu1 %1787 }
 0x1c7   : > { %1421 = vrot.lane.b32.xlu0 %v4836_v22, %s4266_s21  ;;  %v2300_v9 = vsel %vm2295_vm8, %v2267_v18, %v1788_v26 }
 0x1c8   : > { %1295 = vrot.lane.b32.xlu1 %v1085_v24, %s4264_s29 }
 0x1c9   : > { %v4846_v27 = vpop.permute.xlu0 %1157 }
 0x1ca   : > { %v4848_v32 = vpop.permute.xlu1 %1407 }
 0x1cb   : > { %1167 = vrot.lane.b32.xlu0 %v1053_v1, %s4263_s28  ;;  %v778_v1 = vmax.f32 %v720_v62, 0.0 }
 0x1cc   : > { %1553 = vrot.lane.b32.xlu1 %v961_v31, %s4265_s17 }
 0x1cd   : > { %v4855_v36 = vpop.permute.xlu0 %1665  ;;  %811 = vst.msk [vmem:[#allocation2 + $0x141] sm:$0xff] %vm331_vm1, %v778_v1 }
 0x1ce   : > { %v1916_v44 = vpop.permute.xlu1 %1915 }
 0x1cf   : > { %1675 = vrot.lane.b32.xlu0 %v1085_v24, %s4267_s22  ;;  %v2333_v50 = vsel %vm2328_vm9, %v2300_v9, %v1916_v44  ;;  %v730_v24 = vadd.f32 %v3832_v20, %v4495_v30 }
 0x1d0   : > { %2061 = vrot.lane.b32.xlu1 %v1088_v48, %s5916_s26 }
 0x1d1   : > { %v4867_v38 = vpop.permute.xlu0 %1285  ;;  %v780_v26 = vmax.f32 %v730_v24, 0.0 }
 0x1d2   : > { %v4873_v29 = vpop.permute.xlu1 %1535 }
 0x1d3   : > { %1933 = vrot.lane.b32.xlu0 %v961_v31, %s4269_s16  ;;  %813 = vst.msk [vmem:[#allocation2 + $0x159] sm:$0xff] %vm331_vm1, %v780_v26 }
 0x1d4   : > { %1803 = vrot.lane.b32.xlu1 %v4878_v51, %s4270_s23 }
 0x1d5   : > { %v1790_v37 = vpop.permute.xlu0 %1789 }
 0x1d6   : > { %v2301_v54 = vsel %vm2295_vm8, %v2268_v17, %v1790_v37  ;;  %v2044_v52 = vpop.permute.xlu1 %2043 }
 0x1d7   : > { %v2334_v13 = vsel %vm2328_vm9, %v2301_v54, %v1918_v25  ;;  %v2366_v19 = vsel %vm2361_vm10, %v2333_v50, %v2044_v52  ;;  %1173 = vrot.lane.b32.xlu0 %v961_v31, %s4263_s28  ;;  %v724_v25 = vpop.f32.mrb[27].mxu1  ;;  %v2138_v50 = vsel %vm331_vm1, %v4624_v53, %v4774_v35  ;;  %v2764_v53 = vld [vmem:[%s5907_s5] sm:$0xff] }
 0x1d8   : > { %1423 = vrot.lane.b32.xlu1 %v4878_v51, %s4266_s21  ;;  %3863 = vmatprep.mubr.msk.f32.mxu1 %vm2410_vm11, %v2366_v19  ;;  %v2367_v42 = vsel %vm2361_vm10, %v2334_v13, %v2046_v21  ;;  %v725_v31 = vadd.f32 %v4495_v30, %v724_v25  ;;  %v3835_v34 = vpop.f32.mrb[28].mxu1  ;;  %v2171_v13 = vsel %vm2163_vm4, %v2138_v50, %v4795_v12 }
 0x1d9   : > { %v1410_v23 = vpop.permute.xlu0 %1409  ;;  %3864 = vmatmul.mubr.msk.f32.gmra.mrb[36].mxu1 %vm2410_vm11, %v2367_v42  ;;  %v740_v44 = vadd.f32 %v3835_v34, %v4495_v30  ;;  %v734_v47 = vpop.f32.mrb[29].mxu1  ;;  %v2137_v19 = vsel %vm331_vm1, %v4611_v45, %v4828_v2  ;;  %3905 = vmatprep.subr.mxu0 %v2764_v53  ;;  %v1090_v34 = vld [vmem:[#allocation2 + $0xe2] sm:$0xff] }
 0x1da   : > { %v4896_v41 = vpop.permute.xlu1 %1283  ;;  %v779_v40 = vmax.f32 %v725_v31, 0.0  ;;  %v735_v56 = vadd.f32 %v4495_v30, %v734_v47  ;;  %v3838_v49 = vpop.f32.mrb[30].mxu1  ;;  %v2170_v45 = vsel %vm2163_vm4, %v2137_v19, %v4824_v46  ;;  %3906 = vmatpush3.msra.mxu0 %v2764_v53  ;;  %v1059_v19 = vld [vmem:[#allocation2 + $0xf1] sm:$0xff] }
 0x1db   : > { %1681 = vrot.lane.b32.xlu0 %v1088_v48, %s4267_s22  ;;  %v782_v11 = vmax.f32 %v740_v44, 0.0  ;;  %v750_v18 = vadd.f32 %v3838_v49, %v4495_v30  ;;  %v744_v9 = vpop.f32.mrb[31].mxu1  ;;  %v2203_v12 = vsel %vm2196_vm5, %v2170_v45, %v4848_v32 }
 0x1dc   : > { %1931 = vrot.lane.b32.xlu1 %v1055_v55, %s4269_s16  ;;  %812 = vst.msk [vmem:[#allocation2 + $0x151] sm:$0xff] %vm331_vm1, %v779_v40  ;;  %v781_v37 = vmax.f32 %v735_v56, 0.0  ;;  %v745_v17 = vadd.f32 %v4495_v30, %v744_v9  ;;  %v2236_v62 = vsel %vm2229_vm6, %v2203_v12, %v4873_v29  ;;  %v4981_v29 = vld [vmem:[#allocation2 + $0xe0] sm:$0xff]  ;;  %v5010_v56 = vld [vmem:[#allocation2 + $0xf0] sm:$0xff] }
 0x1dd   : > { %v4900_v60 = vpop.permute.xlu0 %1155  ;;  %815 = vst.msk [vmem:[#allocation2 + $0x171] sm:$0xff] %vm331_vm1, %v782_v11  ;;  %v784_v52 = vmax.f32 %v750_v18, 0.0  ;;  %v2140_v11 = vsel %vm331_vm1, %v4654_v3, %v4846_v27 }
 0x1de   : > { %v4902_v61 = vpop.permute.xlu1 %1541  ;;  %814 = vst.msk [vmem:[#allocation2 + $0x169] sm:$0xff] %vm331_vm1, %v781_v37  ;;  %v783_v30 = vmax.f32 %v745_v17, 0.0  ;;  %v2173_v9 = vsel %vm2163_vm4, %v2140_v11, %v4867_v38  ;;  %v2139_v37 = vsel %vm331_vm1, %v4639_v58, %v4900_v60  ;;  %v5039_v60 = vld [vmem:[#allocation2 + $0xf8] sm:$0xff]  ;;  %v1061_v11 = vld [vmem:[#allocation2 + $0x109] sm:$0xff] }
 0x1df   : > { %1301 = vrot.lane.b32.xlu0 %v1088_v48, %s4264_s29  ;;  %817 = vst.msk [vmem:[#allocation2 + $0x189] sm:$0xff] %vm331_vm1, %v784_v52  ;;  %v2172_v3 = vsel %vm2163_vm4, %v2139_v37, %v4896_v41 }
 0x1e0   : > { %1551 = vrot.lane.b32.xlu1 %v1055_v55, %s4265_s17  ;;  %816 = vst.msk [vmem:[#allocation2 + $0x181] sm:$0xff] %vm331_vm1, %v783_v30 }
 0x1e1   : > { %v4908_v4 = vpop.permute.xlu0 %1663 }
 0x1e2   : > { %v4910_v7 = vpop.permute.xlu1 %2049  ;;  %v2269_v46 = vsel %vm2262_vm7, %v2236_v62, %v4908_v4  ;;  %v1091_v62 = vld [vmem:[#allocation2 + $0xf2] sm:$0xff] }
 0x1e3   : > { %1805 = vrot.lane.b32.xlu0 %v4912_v8, %s4270_s23 }
 0x1e4   : > { %2059 = vrot.lane.b32.xlu1 %v1087_v10, %s5916_s26 }
 0x1e5   : > { %v4919_v15 = vpop.permute.xlu0 %1921 }
 0x1e6   : > { %v1792_v21 = vpop.permute.xlu1 %1791 }
 0x1e7   : > { %1425 = vrot.lane.b32.xlu0 %v4912_v8, %s4266_s21  ;;  %v2302_v0 = vsel %vm2295_vm8, %v2269_v46, %v1792_v21 }
 0x1e8   : > { %1299 = vrot.lane.b32.xlu1 %v1087_v10, %s4264_s29 }
 0x1e9   : > { %v4926_v39 = vpop.permute.xlu0 %1161 }
 0x1ea   : > { %v4931_v48 = vpop.permute.xlu1 %1411 }
 0x1eb   : > { %1171 = vrot.lane.b32.xlu0 %v1055_v55, %s4263_s28  ;;  %v2204_v55 = vsel %vm2196_vm5, %v2171_v13, %v1410_v23  ;;  %v2205_v38 = vsel %vm2196_vm5, %v2172_v3, %v4931_v48 }
 0x1ec   : > { %1807 = vrot.lane.b32.xlu1 %v4928_v43, %s4270_s23  ;;  %v2237_v2 = vsel %vm2229_vm6, %v2204_v55, %v4830_v5 }
 0x1ed   : > { %v4944_v54 = vpop.permute.xlu0 %1669  ;;  %v2270_v5 = vsel %vm2262_vm7, %v2237_v2, %v4855_v36 }
 0x1ee   : > { %v1920_v42 = vpop.permute.xlu1 %1919 }
 0x1ef   : > { %1679 = vrot.lane.b32.xlu0 %v1087_v10, %s4267_s22  ;;  %v2335_v1 = vsel %vm2328_vm9, %v2302_v0, %v1920_v42 }
 0x1f0   : > { %1427 = vrot.lane.b32.xlu1 %v4928_v43, %s4266_s21 }
 0x1f1   : > { %v4964_v35 = vpop.permute.xlu0 %1289 }
 0x1f2   : > { %v1540_v23 = vpop.permute.xlu1 %1539 }
 0x1f3   : > { %1937 = vrot.lane.b32.xlu0 %v1058_v57, %s4269_s16  ;;  %v2238_v13 = vsel %vm2229_vm6, %v2205_v38, %v1540_v23 }
 0x1f4   : > { %1935 = vrot.lane.b32.xlu1 %v1057_v63, %s4269_s16 }
 0x1f5   : > { %v1794_v32 = vpop.permute.xlu0 %1793 }
 0x1f6   : > { %v2303_v6 = vsel %vm2295_vm8, %v2270_v5, %v1794_v32  ;;  %v2048_v10 = vpop.permute.xlu1 %2047  ;;  %v1092_v5 = vld [vmem:[#allocation2 + $0xfa] sm:$0xff] }
 0x1f7   : > { %v2336_v20 = vsel %vm2328_vm9, %v2303_v6, %v4919_v15  ;;  %v2368_v4 = vsel %vm2361_vm10, %v2335_v1, %v2048_v10  ;;  %1809 = vrot.lane.b32.xlu0 %v4981_v29, %s4270_s23  ;;  %v1089_v15 = vld [vmem:[#allocation2 + $0xda] sm:$0xff] }
 0x1f8   : > { %1555 = vrot.lane.b32.xlu1 %v1057_v63, %s4265_s17  ;;  %3866 = vmatprep.mubr.msk.f32.mxu1 %vm2410_vm11, %v2368_v4  ;;  %v2369_v36 = vsel %vm2361_vm10, %v2336_v20, %v4910_v7  ;;  %v5075_v20 = vld [vmem:[#allocation2 + $0x108] sm:$0xff] }
 0x1f9   : > { %v1414_v21 = vpop.permute.xlu0 %1413  ;;  %3867 = vmatmul.mubr.msk.f32.gmra.mrb[38].mxu1 %vm2410_vm11, %v2369_v36  ;;  %v2142_v36 = vsel %vm331_vm1, %v4698_v33, %v4926_v39 }
 0x1fa   : > { %v4993_v24 = vpop.permute.xlu1 %1287  ;;  %v2206_v50 = vsel %vm2196_vm5, %v2173_v9, %v1414_v21 }
 0x1fb   : > { %1429 = vrot.lane.b32.xlu0 %v4981_v29, %s4266_s21  ;;  %v2239_v52 = vsel %vm2229_vm6, %v2206_v50, %v4902_v61 }
 0x1fc   : > { %2063 = vrot.lane.b32.xlu1 %v1089_v15, %s5916_s26  ;;  %v2272_v48 = vsel %vm2262_vm7, %v2239_v52, %v4944_v54 }
 0x1fd   : > { %v4998_v25 = vpop.permute.xlu0 %1159 }
 0x1fe   : > { %v5000_v26 = vpop.permute.xlu1 %1545 }
 0x1ff   : > { %1175 = vrot.lane.b32.xlu0 %v1057_v63, %s4263_s28 }
 0x200   : > { %1557 = vrot.lane.b32.xlu1 %v1058_v57, %s4265_s17 }
 0x201   : > { %v1668_v7 = vpop.permute.xlu0 %1667 }
 0x202   : > { %v2054_v31 = vpop.permute.xlu1 %2053  ;;  %v2271_v42 = vsel %vm2262_vm7, %v2238_v13, %v1668_v7  ;;  %v2141_v7 = vsel %vm331_vm1, %v4677_v14, %v4998_v25  ;;  %v5104_v25 = vld [vmem:[#allocation2 + $0x110] sm:$0xff] }
 0x203   : > { %1683 = vrot.lane.b32.xlu0 %v1089_v15, %s4267_s22  ;;  %v2174_v33 = vsel %vm2163_vm4, %v2141_v7, %v4993_v24  ;;  %v1062_v13 = vld [vmem:[#allocation2 + $0x111] sm:$0xff] }
 0x204   : > { %2065 = vrot.lane.b32.xlu1 %v1090_v34, %s5916_s26 }
 0x205   : > { %v1926_v44 = vpop.permute.xlu0 %1925 }
 0x206   : > { %v1796_v47 = vpop.permute.xlu1 %1795 }
 0x207   : > { %1177 = vrot.lane.b32.xlu0 %v1058_v57, %s4263_s28  ;;  %v2304_v41 = vsel %vm2295_vm8, %v2271_v42, %v1796_v47  ;;  %v1060_v57 = vld [vmem:[#allocation2 + $0xf9] sm:$0xff] }
 0x208   : > { %1303 = vrot.lane.b32.xlu1 %v1089_v15, %s4264_s29  ;;  %v2175_v15 = vsel %vm2163_vm4, %v2142_v36, %v4964_v35  ;;  %v1063_v36 = vld [vmem:[#allocation2 + $0x121] sm:$0xff] }
 0x209   : > { %v5008_v40 = vpop.permute.xlu0 %1165 }
 0x20a   : > { %v5012_v49 = vpop.permute.xlu1 %1415 }
 0x20b   : > { %1685 = vrot.lane.b32.xlu0 %v1090_v34, %s4267_s22  ;;  %v2207_v35 = vsel %vm2196_vm5, %v2174_v33, %v5012_v49 }
 0x20c   : > { %1811 = vrot.lane.b32.xlu1 %v5010_v56, %s4270_s23 }
 0x20d   : > { %v5020_v18 = vpop.permute.xlu0 %1673 }
 0x20e   : > { %v1924_v17 = vpop.permute.xlu1 %1923 }
 0x20f   : > { %1305 = vrot.lane.b32.xlu0 %v1090_v34, %s4264_s29  ;;  %v2337_v61 = vsel %vm2328_vm9, %v2304_v41, %v1924_v17 }
 0x210   : > { %1431 = vrot.lane.b32.xlu1 %v5010_v56, %s4266_s21 }
 0x211   : > { %v5033_v27 = vpop.permute.xlu0 %1293 }
 0x212   : > { %v1544_v58 = vpop.permute.xlu1 %1543 }
 0x213   : > { %1813 = vrot.lane.b32.xlu0 %v5039_v60, %s4270_s23  ;;  %v2240_v47 = vsel %vm2229_vm6, %v2207_v35, %v1544_v58 }
 0x214   : > { %1939 = vrot.lane.b32.xlu1 %v1059_v19, %s4269_s16 }
 0x215   : > { %v1798_v30 = vpop.permute.xlu0 %1797 }
 0x216   : > { %v2305_v55 = vsel %vm2295_vm8, %v2272_v48, %v1798_v30  ;;  %v2052_v53 = vpop.permute.xlu1 %2051 }
 0x217   : > { %v2338_v45 = vsel %vm2328_vm9, %v2305_v55, %v1926_v44  ;;  %v2370_v12 = vsel %vm2361_vm10, %v2337_v61, %v2052_v53  ;;  %1433 = vrot.lane.b32.xlu0 %v5039_v60, %s4266_s21  ;;  %v1094_v61 = vld [vmem:[#allocation2 + $0x112] sm:$0xff] }
 0x218   : > { %1559 = vrot.lane.b32.xlu1 %v1059_v19, %s4265_s17  ;;  %3869 = vmatprep.mubr.msk.f32.mxu1 %vm2410_vm11, %v2370_v12  ;;  %v2371_v2 = vsel %vm2361_vm10, %v2338_v45, %v2054_v31  ;;  %v5140_v12 = vld [vmem:[#allocation2 + $0x120] sm:$0xff] }
 0x219   : > { %v1418_v23 = vpop.permute.xlu0 %1417  ;;  %3870 = vmatmul.mubr.msk.f32.gmra.mrb[40].mxu1 %vm2410_vm11, %v2371_v2 }
 0x21a   : > { %v5059_v54 = vpop.permute.xlu1 %1291  ;;  %v2208_v34 = vsel %vm2196_vm5, %v2175_v15, %v1418_v23  ;;  %v2144_v23 = vsel %vm331_vm1, %v4764_v28, %v5008_v40 }
 0x21b   : > { %1941 = vrot.lane.b32.xlu0 %v1060_v57, %s4269_s16  ;;  %v2241_v44 = vsel %vm2229_vm6, %v2208_v34, %v5000_v26 }
 0x21c   : > { %2067 = vrot.lane.b32.xlu1 %v1091_v62, %s5916_s26  ;;  %v2274_v49 = vsel %vm2262_vm7, %v2241_v44, %v5020_v18 }
 0x21d   : > { %v5063_v63 = vpop.permute.xlu0 %1163 }
 0x21e   : > { %v5065_v46 = vpop.permute.xlu1 %1549 }
 0x21f   : > { %1179 = vrot.lane.b32.xlu0 %v1059_v19, %s4263_s28  ;;  %v1093_v19 = vld [vmem:[#allocation2 + $0x10a] sm:$0xff] }
 0x220   : > { %1561 = vrot.lane.b32.xlu1 %v1060_v57, %s4265_s17 }
 0x221   : > { %v1672_v0 = vpop.permute.xlu0 %1671 }
 0x222   : > { %v2058_v32 = vpop.permute.xlu1 %2057  ;;  %v2273_v9 = vsel %vm2262_vm7, %v2240_v47, %v1672_v0  ;;  %v2143_v0 = vsel %vm331_vm1, %v4732_v59, %v5063_v63  ;;  %v5167_v63 = vld [vmem:[#allocation2 + $0x128] sm:$0xff] }
 0x223   : > { %1687 = vrot.lane.b32.xlu0 %v1091_v62, %s4267_s22  ;;  %v2176_v28 = vsel %vm2163_vm4, %v2143_v0, %v5059_v54  ;;  %v1064_v47 = vld [vmem:[#allocation2 + $0x129] sm:$0xff] }
 0x224   : > { %2069 = vrot.lane.b32.xlu1 %v1092_v5, %s5916_s26 }
 0x225   : > { %v1930_v1 = vpop.permute.xlu0 %1929 }
 0x226   : > { %v1800_v6 = vpop.permute.xlu1 %1799 }
 0x227   : > { %1181 = vrot.lane.b32.xlu0 %v1060_v57, %s4263_s28  ;;  %v2306_v24 = vsel %vm2295_vm8, %v2273_v9, %v1800_v6 }
 0x228   : > { %1307 = vrot.lane.b32.xlu1 %v1091_v62, %s4264_s29  ;;  %v2177_v62 = vsel %vm2163_vm4, %v2144_v23, %v5033_v27 }
 0x229   : > { %v5073_v10 = vpop.permute.xlu0 %1169 }
 0x22a   : > { %v5077_v4 = vpop.permute.xlu1 %1419 }
 0x22b   : > { %1689 = vrot.lane.b32.xlu0 %v1092_v5, %s4267_s22  ;;  %v2209_v27 = vsel %vm2196_vm5, %v2176_v28, %v5077_v4 }
 0x22c   : > { %1815 = vrot.lane.b32.xlu1 %v5075_v20, %s4270_s23 }
 0x22d   : > { %v5085_v21 = vpop.permute.xlu0 %1677 }
 0x22e   : > { %v1928_v31 = vpop.permute.xlu1 %1927 }
 0x22f   : > { %1309 = vrot.lane.b32.xlu0 %v1092_v5, %s4264_s29  ;;  %v2339_v26 = vsel %vm2328_vm9, %v2306_v24, %v1928_v31 }
 0x230   : > { %1435 = vrot.lane.b32.xlu1 %v5075_v20, %s4266_s21 }
 0x231   : > { %v5098_v39 = vpop.permute.xlu0 %1297 }
 0x232   : > { %v1548_v14 = vpop.permute.xlu1 %1547 }
 0x233   : > { %1817 = vrot.lane.b32.xlu0 %v5104_v25, %s4270_s23  ;;  %v2242_v6 = vsel %vm2229_vm6, %v2209_v27, %v1548_v14 }
 0x234   : > { %1943 = vrot.lane.b32.xlu1 %v1061_v11, %s4269_s16 }
 0x235   : > { %v1802_v37 = vpop.permute.xlu0 %1801 }
 0x236   : > { %v2307_v17 = vsel %vm2295_vm8, %v2274_v49, %v1802_v37  ;;  %v2056_v50 = vpop.permute.xlu1 %2055 }
 0x237   : > { %v2340_v3 = vsel %vm2328_vm9, %v2307_v17, %v1930_v1  ;;  %v2372_v38 = vsel %vm2361_vm10, %v2339_v26, %v2056_v50  ;;  %1437 = vrot.lane.b32.xlu0 %v5104_v25, %s4266_s21  ;;  %v1096_v26 = vld [vmem:[#allocation2 + $0x12a] sm:$0xff] }
 0x238   : > { %1563 = vrot.lane.b32.xlu1 %v1061_v11, %s4265_s17  ;;  %3872 = vmatprep.mubr.msk.f32.mxu1 %vm2410_vm11, %v2372_v38  ;;  %v2373_v52 = vsel %vm2361_vm10, %v2340_v3, %v2058_v32 }
 0x239   : > { %v1422_v58 = vpop.permute.xlu0 %1421  ;;  %3873 = vmatmul.mubr.msk.f32.gmra.mrb[42].mxu1 %vm2410_vm11, %v2373_v52 }
 0x23a   : > { %v5124_v18 = vpop.permute.xlu1 %1295  ;;  %v2210_v5 = vsel %vm2196_vm5, %v2177_v62, %v1422_v58 }
 0x23b   : > { %1945 = vrot.lane.b32.xlu0 %v1062_v13, %s4269_s16  ;;  %v2243_v1 = vsel %vm2229_vm6, %v2210_v5, %v5065_v46 }
 0x23c   : > { %2071 = vrot.lane.b32.xlu1 %v1093_v19, %s5916_s26  ;;  %v2276_v4 = vsel %vm2262_vm7, %v2243_v1, %v5085_v21 }
 0x23d   : > { %v5128_v42 = vpop.permute.xlu0 %1167 }
 0x23e   : > { %v5130_v41 = vpop.permute.xlu1 %1553  ;;  %v2145_v17 = vsel %vm331_vm1, %v4806_v16, %v5128_v42  ;;  %v2146_v16 = vsel %vm331_vm1, %v4836_v22, %v5073_v10 }
 0x23f   : > { %1183 = vrot.lane.b32.xlu0 %v1061_v11, %s4263_s28  ;;  %v1095_v11 = vld [vmem:[#allocation2 + $0x122] sm:$0xff]  ;;  %v2178_v38 = vsel %vm2163_vm4, %v2145_v17, %v5124_v18  ;;  %v5219_v18 = vld [vmem:[%s5906_s4] ss:$0 sm:$0xff] }
 0x240   : > { %1565 = vrot.lane.b32.xlu1 %v1062_v13, %s4265_s17 }
 0x241   : > { %v1676_v30 = vpop.permute.xlu0 %1675 }
 0x242   : > { %v2062_v48 = vpop.permute.xlu1 %2061  ;;  %v2275_v15 = vsel %vm2262_vm7, %v2242_v6, %v1676_v30 }
 0x243   : > { %1691 = vrot.lane.b32.xlu0 %v1093_v19, %s4267_s22 }
 0x244   : > { %2073 = vrot.lane.b32.xlu1 %v1094_v61, %s5916_s26 }
 0x245   : > { %v1934_v55 = vpop.permute.xlu0 %1933 }
 0x246   : > { %v1804_v53 = vpop.permute.xlu1 %1803 }
 0x247   : > { %1185 = vrot.lane.b32.xlu0 %v1062_v13, %s4263_s28  ;;  %v2308_v54 = vsel %vm2295_vm8, %v2275_v15, %v1804_v53 }
 0x248   : > { %1311 = vrot.lane.b32.xlu1 %v1093_v19, %s4264_s29  ;;  %v5208_v19 = vld [vmem:[#allocation2 + $0x138] sm:$0xff] }
 0x249   : > { %v5138_v45 = vpop.permute.xlu0 %1173 }
 0x24a   : > { %v1424_v2 = vpop.permute.xlu1 %1423 }
 0x24b   : > { %1693 = vrot.lane.b32.xlu0 %v1094_v61, %s4267_s22  ;;  %v2211_v52 = vsel %vm2196_vm5, %v2178_v38, %v1424_v2 }
 0x24c   : > { %1819 = vrot.lane.b32.xlu1 %v5140_v12, %s4270_s23 }
 0x24d   : > { %v5148_v57 = vpop.permute.xlu0 %1681 }
 0x24e   : > { %v1932_v32 = vpop.permute.xlu1 %1931 }
 0x24f   : > { %1313 = vrot.lane.b32.xlu0 %v1094_v61, %s4264_s29  ;;  %v2341_v46 = vsel %vm2328_vm9, %v2308_v54, %v1932_v32 }
 0x250   : > { %1439 = vrot.lane.b32.xlu1 %v5140_v12, %s4266_s21 }
 0x251   : > { %v5161_v40 = vpop.permute.xlu0 %1301 }
 0x252   : > { %v1552_v59 = vpop.permute.xlu1 %1551 }
 0x253   : > { %1821 = vrot.lane.b32.xlu0 %v5167_v63, %s4270_s23  ;;  %v2244_v58 = vsel %vm2229_vm6, %v2211_v52, %v1552_v59 }
 0x254   : > { %1947 = vrot.lane.b32.xlu1 %v1063_v36, %s4269_s16 }
 0x255   : > { %v1806_v7 = vpop.permute.xlu0 %1805 }
 0x256   : > { %v2309_v31 = vsel %vm2295_vm8, %v2276_v4, %v1806_v7  ;;  %v2060_v34 = vpop.permute.xlu1 %2059 }
 0x257   : > { %v2342_v33 = vsel %vm2328_vm9, %v2309_v31, %v1934_v55  ;;  %v2374_v35 = vsel %vm2361_vm10, %v2341_v46, %v2060_v34  ;;  %1441 = vrot.lane.b32.xlu0 %v5167_v63, %s4266_s21  ;;  %v1066_v31 = vld [vmem:[#allocation2 + $0x141] sm:$0xff] }
 0x258   : > { %1567 = vrot.lane.b32.xlu1 %v1063_v36, %s4265_s17  ;;  %3875 = vmatprep.mubr.msk.f32.mxu1 %vm2410_vm11, %v2374_v35  ;;  %v2375_v44 = vsel %vm2361_vm10, %v2342_v33, %v2062_v48  ;;  %v2179_v48 = vsel %vm2163_vm4, %v2146_v16, %v5098_v39  ;;  %v1097_v34 = vld [vmem:[#allocation2 + $0x13a] sm:$0xff] }
 0x259   : > { %v1426_v14 = vpop.permute.xlu0 %1425  ;;  %3876 = vmatmul.mubr.msk.f32.gmra.mrb[44].mxu1 %vm2410_vm11, %v2375_v44 }
 0x25a   : > { %v5187_v21 = vpop.permute.xlu1 %1299  ;;  %v2212_v61 = vsel %vm2196_vm5, %v2179_v48, %v1426_v14 }
 0x25b   : > { %1949 = vrot.lane.b32.xlu0 %v1064_v47, %s4269_s16  ;;  %v2245_v0 = vsel %vm2229_vm6, %v2212_v61, %v5130_v41  ;;  %v5247_v41 = vld [vmem:[#allocation2 + $0x140] sm:$0xff]  ;;  %v2148_v61 = vsel %vm331_vm1, %v4912_v8, %v5138_v45  ;;  %v5316_v8 = vld [vmem:[#allocation2 + $0x158] sm:$0xff] }
 0x25c   : > { %2075 = vrot.lane.b32.xlu1 %v1095_v11, %s5916_s26  ;;  %v2278_v1 = vsel %vm2262_vm7, %v2245_v0, %v5148_v57 }
 0x25d   : > { %v5191_v9 = vpop.permute.xlu0 %1171 }
 0x25e   : > { %v1808_v24 = vpop.permute.xlu1 %1807 }
 0x25f   : > { %1187 = vrot.lane.b32.xlu0 %v1063_v36, %s4263_s28  ;;  %v1065_v36 = vld [vmem:[#allocation2 + $0x139] sm:$0xff] }
 0x260   : > { %1569 = vrot.lane.b32.xlu1 %v1064_v47, %s4265_s17 }
 0x261   : > { %v1680_v37 = vpop.permute.xlu0 %1679 }
 0x262   : > { %v5195_v49 = vpop.permute.xlu1 %1427  ;;  %v2277_v42 = vsel %vm2262_vm7, %v2244_v58, %v1680_v37 }
 0x263   : > { %1695 = vrot.lane.b32.xlu0 %v1095_v11, %s4267_s22  ;;  %v2310_v22 = vsel %vm2295_vm8, %v2277_v42, %v1808_v24  ;;  %v2147_v24 = vsel %vm331_vm1, %v4878_v51, %v5191_v9 }
 0x264   : > { %2077 = vrot.lane.b32.xlu1 %v1096_v26, %s5916_s26 }
 0x265   : > { %v1938_v50 = vpop.permute.xlu0 %1937 }
 0x266   : > { %v1936_v3 = vpop.permute.xlu1 %1935 }
 0x267   : > { %1189 = vrot.lane.b32.xlu0 %v1064_v47, %s4263_s28  ;;  %v2343_v23 = vsel %vm2328_vm9, %v2310_v22, %v1936_v3  ;;  %v1098_v47 = vld [vmem:[#allocation2 + $0x142] sm:$0xff]  ;;  %v2181_v22 = vsel %vm2163_vm4, %v2148_v61, %v5161_v40  ;;  %v1067_v40 = vld [vmem:[#allocation2 + $0x151] sm:$0xff] }
 0x268   : > { %1315 = vrot.lane.b32.xlu1 %v1095_v11, %s4264_s29 }
 0x269   : > { %v1810_v13 = vpop.permute.xlu0 %1809 }
 0x26a   : > { %v5214_v30 = vpop.permute.xlu1 %1555  ;;  %v2311_v6 = vsel %vm2295_vm8, %v2278_v1, %v1810_v13 }
 0x26b   : > { %1697 = vrot.lane.b32.xlu0 %v1096_v26, %s4267_s22  ;;  %v2344_v54 = vsel %vm2328_vm9, %v2311_v6, %v1938_v50  ;;  %v5283_v50 = vld [vmem:[#allocation2 + $0x150] sm:$0xff]  ;;  %v1068_v6 = vld [vmem:[#allocation2 + $0x159] sm:$0xff] }
 0x26c   : > { %v3859_v55 = vpop.f32.mrb[32].mxu1  ;;  %1823 = vrot.lane.b32.xlu1 %v5208_v19, %s4270_s23 }
 0x26d   : > { %v2579_v10 = vadd.f32 %v3859_v55, %v5219_v18  ;;  %v5229_v53 = vpop.permute.xlu0 %1429  ;;  %v2573_v2 = vpop.f32.mrb[33].mxu1 }
 0x26e   : > { %v2574_v62 = vadd.f32 %v5219_v18, %v2573_v2  ;;  %v2064_v39 = vpop.permute.xlu1 %2063 }
 0x26f   : > { %v2376_v32 = vsel %vm2361_vm10, %v2343_v23, %v2064_v39  ;;  %1317 = vrot.lane.b32.xlu0 %v1096_v26, %s4264_s29  ;;  %v2733_v28 = vmax.f32 %v2579_v10, 0.0  ;;  %v2180_v26 = vsel %vm2163_vm4, %v2147_v24, %v5187_v21  ;;  %v2214_v23 = vsel %vm2196_vm5, %v2181_v22, %v5229_v53  ;;  %v5355_v24 = vld [vmem:[#allocation2 + $0x168] sm:$0xff] }
 0x270   : > { %v2732_v5 = vmax.f32 %v2574_v62, 0.0  ;;  %1443 = vrot.lane.b32.xlu1 %v5208_v19, %s4266_s21  ;;  %3878 = vmatprep.mubr.msk.f32.mxu1 %vm2410_vm11, %v2376_v32  ;;  %v2213_v3 = vsel %vm2196_vm5, %v2180_v26, %v5195_v49 }
 0x271   : > { %v5240_v27 = vpop.permute.xlu0 %1175  ;;  %v2246_v51 = vsel %vm2229_vm6, %v2213_v3, %v5214_v30 }
 0x272   : > { %3907 = vmatprep.mubr.msk.f32.mxu0 %vm331_vm1, %v2732_v5  ;;  %v5245_v59 = vpop.permute.xlu1 %1557 }
 0x273   : > { %1825 = vrot.lane.b32.xlu0 %v5247_v41, %s4270_s23  ;;  %3908 = vmatmul.mubr.msk.f32.vlgmr.msra.gmra.mrb[0].mxu0 %vm331_vm1, %v2733_v28  ;;  %v2247_v45 = vsel %vm2229_vm6, %v2214_v23, %v5245_v59 }
 0x274   : > { %1951 = vrot.lane.b32.xlu1 %v1065_v36, %s4269_s16 }
 0x275   : > { %v1684_v15 = vpop.permute.xlu0 %1683 }
 0x276   : > { %v2066_v57 = vpop.permute.xlu1 %2065  ;;  %v2279_v9 = vsel %vm2262_vm7, %v2246_v51, %v1684_v15 }
 0x277   : > { %v2377_v7 = vsel %vm2361_vm10, %v2344_v54, %v2066_v57  ;;  %1445 = vrot.lane.b32.xlu0 %v5247_v41, %s4266_s21 }
 0x278   : > { %1571 = vrot.lane.b32.xlu1 %v1065_v36, %s4265_s17  ;;  %3879 = vmatmul.mubr.msk.f32.gmra.mrb[46].mxu1 %vm2410_vm11, %v2377_v7 }
 0x279   : > { %v5260_v4 = vpop.permute.xlu0 %1177 }
 0x27a   : > { %v5262_v46 = vpop.permute.xlu1 %1303 }
 0x27b   : > { %1953 = vrot.lane.b32.xlu0 %v1066_v31, %s4269_s16 }
 0x27c   : > { %2079 = vrot.lane.b32.xlu1 %v1097_v34, %s5916_s26 }
 0x27d   : > { %v1686_v33 = vpop.permute.xlu0 %1685 }
 0x27e   : > { %v1812_v35 = vpop.permute.xlu1 %1811  ;;  %v2280_v39 = vsel %vm2262_vm7, %v2247_v45, %v1686_v33 }
 0x27f   : > { %1191 = vrot.lane.b32.xlu0 %v1065_v36, %s4263_s28  ;;  %v2312_v52 = vsel %vm2295_vm8, %v2279_v9, %v1812_v35  ;;  %v1099_v36 = vld [vmem:[#allocation2 + $0x152] sm:$0xff]  ;;  %v2149_v35 = vsel %vm331_vm1, %v4928_v43, %v5240_v27 }
 0x280   : > { %1573 = vrot.lane.b32.xlu1 %v1066_v31, %s4265_s17 }
 0x281   : > { %v5268_v44 = vpop.permute.xlu0 %1305 }
 0x282   : > { %v5270_v14 = vpop.permute.xlu1 %1431 }
 0x283   : > { %1699 = vrot.lane.b32.xlu0 %v1097_v34, %s4267_s22 }
 0x284   : > { %2081 = vrot.lane.b32.xlu1 %v1098_v47, %s5916_s26 }
 0x285   : > { %v1814_v11 = vpop.permute.xlu0 %1813 }
 0x286   : > { %v1940_v37 = vpop.permute.xlu1 %1939  ;;  %v2313_v53 = vsel %vm2295_vm8, %v2280_v39, %v1814_v11  ;;  %v1070_v39 = vld [vmem:[#allocation2 + $0x171] sm:$0xff] }
 0x287   : > { %1193 = vrot.lane.b32.xlu0 %v1066_v31, %s4263_s28  ;;  %v2345_v49 = vsel %vm2328_vm9, %v2312_v52, %v1940_v37  ;;  %v1100_v31 = vld [vmem:[#allocation2 + $0x15a] sm:$0xff] }
 0x288   : > { %1319 = vrot.lane.b32.xlu1 %v1097_v34, %s4264_s29 }
 0x289   : > { %v5281_v17 = vpop.permute.xlu0 %1433 }
 0x28a   : > { %v5287_v38 = vpop.permute.xlu1 %1559 }
 0x28b   : > { %1701 = vrot.lane.b32.xlu0 %v1098_v47, %s4267_s22 }
 0x28c   : > { %1827 = vrot.lane.b32.xlu1 %v5283_v50, %s4270_s23  ;;  %v3862_v21 = vpop.f32.mrb[34].mxu1 }
 0x28d   : > { %v2589_v58 = vadd.f32 %v3862_v21, %v5219_v18  ;;  %v1942_v13 = vpop.permute.xlu0 %1941  ;;  %v2583_v16 = vpop.f32.mrb[35].mxu1 }
 0x28e   : > { %v2584_v42 = vadd.f32 %v5219_v18, %v2583_v16  ;;  %v2068_v48 = vpop.permute.xlu1 %2067  ;;  %v2346_v32 = vsel %vm2328_vm9, %v2313_v53, %v1942_v13  ;;  %v2150_v13 = vsel %vm331_vm1, %v4981_v29, %v5260_v4  ;;  %v5388_v29 = vld [vmem:[#allocation2 + $0x170] sm:$0xff] }
 0x28f   : > { %v2378_v30 = vsel %vm2361_vm10, %v2345_v49, %v2068_v48  ;;  %1321 = vrot.lane.b32.xlu0 %v1098_v47, %s4264_s29  ;;  %v2735_v10 = vmax.f32 %v2589_v58, 0.0  ;;  %v2182_v47 = vsel %vm2163_vm4, %v2149_v35, %v5262_v46  ;;  %v2183_v49 = vsel %vm2163_vm4, %v2150_v13, %v5268_v44  ;;  %v1069_v44 = vld [vmem:[#allocation2 + $0x169] sm:$0xff] }
 0x290   : > { %v2734_v55 = vmax.f32 %v2584_v42, 0.0  ;;  %1447 = vrot.lane.b32.xlu1 %v5283_v50, %s4266_s21  ;;  %3881 = vmatprep.mubr.msk.f32.mxu1 %vm2410_vm11, %v2378_v30  ;;  %v2215_v37 = vsel %vm2196_vm5, %v2182_v47, %v5270_v14  ;;  %v2216_v30 = vsel %vm2196_vm5, %v2183_v49, %v5281_v17  ;;  %v1101_v53 = vld [vmem:[#allocation2 + $0x16a] sm:$0xff] }
 0x291   : > { %v5309_v2 = vpop.permute.xlu0 %1179  ;;  %v2248_v3 = vsel %vm2229_vm6, %v2215_v37, %v5287_v38 }
 0x292   : > { %v5313_v62 = vpop.permute.xlu1 %1561  ;;  %3910 = vmatprep.mubr.msk.f32.mxu0 %vm331_vm1, %v2734_v55 }
 0x293   : > { %1829 = vrot.lane.b32.xlu0 %v5316_v8, %s4270_s23  ;;  %3911 = vmatmul.mubr.msk.f32.gmra.mrb[2].mxu0 %vm331_vm1, %v2735_v10  ;;  %v2249_v4 = vsel %vm2229_vm6, %v2216_v30, %v5313_v62 }
 0x294   : > { %1955 = vrot.lane.b32.xlu1 %v1067_v40, %s4269_s16 }
 0x295   : > { %v1688_v0 = vpop.permute.xlu0 %1687 }
 0x296   : > { %v2070_v5 = vpop.permute.xlu1 %2069  ;;  %v2281_v43 = vsel %vm2262_vm7, %v2248_v3, %v1688_v0 }
 0x297   : > { %v2379_v28 = vsel %vm2361_vm10, %v2346_v32, %v2070_v5  ;;  %1449 = vrot.lane.b32.xlu0 %v5316_v8, %s4266_s21 }
 0x298   : > { %1575 = vrot.lane.b32.xlu1 %v1067_v40, %s4265_s17  ;;  %3882 = vmatmul.mubr.msk.f32.gmra.mrb[48].mxu1 %vm2410_vm11, %v2379_v28 }
 0x299   : > { %v5332_v1 = vpop.permute.xlu0 %1181 }
 0x29a   : > { %v5334_v59 = vpop.permute.xlu1 %1307 }
 0x29b   : > { %1957 = vrot.lane.b32.xlu0 %v1068_v6, %s4269_s16 }
 0x29c   : > { %2083 = vrot.lane.b32.xlu1 %v1099_v36, %s5916_s26 }
 0x29d   : > { %v1690_v15 = vpop.permute.xlu0 %1689 }
 0x29e   : > { %v1816_v54 = vpop.permute.xlu1 %1815  ;;  %v2282_v55 = vsel %vm2262_vm7, %v2249_v4, %v1690_v15 }
 0x29f   : > { %1195 = vrot.lane.b32.xlu0 %v1067_v40, %s4263_s28  ;;  %v2314_v46 = vsel %vm2295_vm8, %v2281_v43, %v1816_v54  ;;  %v2151_v54 = vsel %vm331_vm1, %v5010_v56, %v5309_v2 }
 0x2a0   : > { %1577 = vrot.lane.b32.xlu1 %v1068_v6, %s4265_s17 }
 0x2a1   : > { %v5340_v57 = vpop.permute.xlu0 %1309 }
 0x2a2   : > { %v5342_v7 = vpop.permute.xlu1 %1435 }
 0x2a3   : > { %1703 = vrot.lane.b32.xlu0 %v1099_v36, %s4267_s22 }
 0x2a4   : > { %2085 = vrot.lane.b32.xlu1 %v1100_v31, %s5916_s26 }
 0x2a5   : > { %v1818_v34 = vpop.permute.xlu0 %1817 }
 0x2a6   : > { %v1944_v33 = vpop.permute.xlu1 %1943  ;;  %v2315_v17 = vsel %vm2295_vm8, %v2282_v55, %v1818_v34  ;;  %v1072_v55 = vld [vmem:[#allocation2 + $0x189] sm:$0xff] }
 0x2a7   : > { %1197 = vrot.lane.b32.xlu0 %v1068_v6, %s4263_s28  ;;  %v2347_v14 = vsel %vm2328_vm9, %v2314_v46, %v1944_v33  ;;  %v1102_v6 = vld [vmem:[#allocation2 + $0x172] sm:$0xff]  ;;  %v1039_v33 = vld [vmem:[#allocation2 + $0x180] sm:$0xff] }
 0x2a8   : > { %1323 = vrot.lane.b32.xlu1 %v1099_v36, %s4264_s29 }
 0x2a9   : > { %v5353_v11 = vpop.permute.xlu0 %1437 }
 0x2aa   : > { %v5359_v26 = vpop.permute.xlu1 %1563 }
 0x2ab   : > { %1705 = vrot.lane.b32.xlu0 %v1100_v31, %s4267_s22 }
 0x2ac   : > { %1831 = vrot.lane.b32.xlu1 %v5355_v24, %s4270_s23  ;;  %v3865_v27 = vpop.f32.mrb[36].mxu1 }
 0x2ad   : > { %v2599_v51 = vadd.f32 %v3865_v27, %v5219_v18  ;;  %v1946_v9 = vpop.permute.xlu0 %1945  ;;  %v2593_v21 = vpop.f32.mrb[37].mxu1 }
 0x2ae   : > { %v2594_v52 = vadd.f32 %v5219_v18, %v2593_v21  ;;  %v2072_v58 = vpop.permute.xlu1 %2071  ;;  %v2348_v10 = vsel %vm2328_vm9, %v2315_v17, %v1946_v9  ;;  %v2152_v9 = vsel %vm331_vm1, %v5039_v60, %v5332_v1  ;;  %v1071_v1 = vld [vmem:[#allocation2 + $0x181] sm:$0xff] }
 0x2af   : > { %v2380_v38 = vsel %vm2361_vm10, %v2347_v14, %v2072_v58  ;;  %1325 = vrot.lane.b32.xlu0 %v1100_v31, %s4264_s29  ;;  %v2737_v42 = vmax.f32 %v2599_v51, 0.0  ;;  %v2184_v31 = vsel %vm2163_vm4, %v2151_v54, %v5334_v59  ;;  %v2185_v14 = vsel %vm2163_vm4, %v2152_v9, %v5340_v57  ;;  %v1103_v17 = vld [vmem:[#allocation2 + $0x182] sm:$0xff] }
 0x2b0   : > { %v2736_v16 = vmax.f32 %v2594_v52, 0.0  ;;  %1451 = vrot.lane.b32.xlu1 %v5355_v24, %s4266_s21  ;;  %3884 = vmatprep.mubr.msk.f32.mxu1 %vm2410_vm11, %v2380_v38  ;;  %v2217_v35 = vsel %vm2196_vm5, %v2184_v31, %v5342_v7  ;;  %v2218_v38 = vsel %vm2196_vm5, %v2185_v14, %v5353_v11 }
 0x2b1   : > { %v5381_v48 = vpop.permute.xlu0 %1183  ;;  %v2250_v37 = vsel %vm2229_vm6, %v2217_v35, %v5359_v26 }
 0x2b2   : > { %v5385_v61 = vpop.permute.xlu1 %1565  ;;  %3913 = vmatprep.mubr.msk.f32.mxu0 %vm331_vm1, %v2736_v16  ;;  %v1040_v16 = vld [vmem:[#allocation2 + $0x188] sm:$0xff] }
 0x2b3   : > { %1833 = vrot.lane.b32.xlu0 %v5388_v29, %s4270_s23  ;;  %3914 = vmatmul.mubr.msk.f32.gmra.mrb[4].mxu0 %vm331_vm1, %v2737_v42  ;;  %v2251_v60 = vsel %vm2229_vm6, %v2218_v38, %v5385_v61 }
 0x2b4   : > { %1959 = vrot.lane.b32.xlu1 %v1069_v44, %s4269_s16 }
 0x2b5   : > { %v1692_v22 = vpop.permute.xlu0 %1691 }
 0x2b6   : > { %v2074_v23 = vpop.permute.xlu1 %2073  ;;  %v2283_v56 = vsel %vm2262_vm7, %v2250_v37, %v1692_v22 }
 0x2b7   : > { %v2381_v45 = vsel %vm2361_vm10, %v2348_v10, %v2074_v23  ;;  %1453 = vrot.lane.b32.xlu0 %v5388_v29, %s4266_s21 }
 0x2b8   : > { %1579 = vrot.lane.b32.xlu1 %v1069_v44, %s4265_s17  ;;  %3885 = vmatmul.mubr.msk.f32.gmra.mrb[50].mxu1 %vm2410_vm11, %v2381_v45 }
 0x2b9   : > { %v5404_v62 = vpop.permute.xlu0 %1185 }
 0x2ba   : > { %v5406_v40 = vpop.permute.xlu1 %1311 }
 0x2bb   : > { %1961 = vrot.lane.b32.xlu0 %v1070_v39, %s4269_s16 }
 0x2bc   : > { %2087 = vrot.lane.b32.xlu1 %v1101_v53, %s5916_s26 }
 0x2bd   : > { %v1694_v0 = vpop.permute.xlu0 %1693 }
 0x2be   : > { %v1820_v32 = vpop.permute.xlu1 %1819  ;;  %v2284_v57 = vsel %vm2262_vm7, %v2251_v60, %v1694_v0 }
 0x2bf   : > { %1199 = vrot.lane.b32.xlu0 %v1069_v44, %s4263_s28  ;;  %v2316_v59 = vsel %vm2295_vm8, %v2283_v56, %v1820_v32  ;;  %v1042_v32 = vld [vmem:[#allocation2 + $0x1a0] sm:$0xff] }
 0x2c0   : > { %1581 = vrot.lane.b32.xlu1 %v1070_v39, %s4265_s17 }
 0x2c1   : > { %v5412_v5 = vpop.permute.xlu0 %1313 }
 0x2c2   : > { %v5414_v28 = vpop.permute.xlu1 %1439 }
 0x2c3   : > { %1707 = vrot.lane.b32.xlu0 %v1101_v53, %s4267_s22 }
 0x2c4   : > { %2089 = vrot.lane.b32.xlu1 %v1102_v6, %s5916_s26 }
 0x2c5   : > { %v1822_v36 = vpop.permute.xlu0 %1821 }
 0x2c6   : > { %v1948_v15 = vpop.permute.xlu1 %1947  ;;  %v2317_v49 = vsel %vm2295_vm8, %v2284_v57, %v1822_v36  ;;  %v2153_v36 = vsel %vm331_vm1, %v5075_v20, %v5381_v48 }
 0x2c7   : > { %1201 = vrot.lane.b32.xlu0 %v1070_v39, %s4263_s28  ;;  %v2349_v7 = vsel %vm2328_vm9, %v2316_v59, %v1948_v15  ;;  %v1104_v39 = vld [vmem:[#allocation2 + $0x18a] sm:$0xff]  ;;  %v1073_v15 = vld [vmem:[#allocation2 + $0x199] sm:$0xff]  ;;  %v2186_v54 = vsel %vm2163_vm4, %v2153_v36, %v5406_v40 }
 0x2c8   : > { %1327 = vrot.lane.b32.xlu1 %v1101_v53, %s4264_s29  ;;  %v1041_v53 = vld [vmem:[#allocation2 + $0x198] sm:$0xff]  ;;  %v2219_v35 = vsel %vm2196_vm5, %v2186_v54, %v5414_v28 }
 0x2c9   : > { %v5425_v34 = vpop.permute.xlu0 %1441 }
 0x2ca   : > { %v5429_v47 = vpop.permute.xlu1 %1567 }
 0x2cb   : > { %1709 = vrot.lane.b32.xlu0 %v1102_v6, %s4267_s22  ;;  %v2252_v56 = vsel %vm2229_vm6, %v2219_v35, %v5429_v47 }
 0x2cc   : > { %1835 = vrot.lane.b32.xlu1 %v1039_v33, %s4270_s23  ;;  %v3868_v2 = vpop.f32.mrb[38].mxu1 }
 0x2cd   : > { %v2609_v3 = vadd.f32 %v3868_v2, %v5219_v18  ;;  %v1950_v43 = vpop.permute.xlu0 %1949  ;;  %v2603_v27 = vpop.f32.mrb[39].mxu1  ;;  %v1105_v2 = vld [vmem:[#allocation2 + $0x19a] sm:$0xff] }
 0x2ce   : > { %v2604_v46 = vadd.f32 %v5219_v18, %v2603_v27  ;;  %v2076_v51 = vpop.permute.xlu1 %2075  ;;  %v2350_v42 = vsel %vm2328_vm9, %v2317_v49, %v1950_v43  ;;  %v1106_v27 = vld [vmem:[#allocation2 + $0x1a2] sm:$0xff] }
 0x2cf   : > { %v2382_v26 = vsel %vm2361_vm10, %v2349_v7, %v2076_v51  ;;  %1329 = vrot.lane.b32.xlu0 %v1102_v6, %s4264_s29  ;;  %v2739_v52 = vmax.f32 %v2609_v3, 0.0  ;;  %v2154_v51 = vsel %vm331_vm1, %v5104_v25, %v5404_v62 }
 0x2d0   : > { %v2738_v21 = vmax.f32 %v2604_v46, 0.0  ;;  %1455 = vrot.lane.b32.xlu1 %v1039_v33, %s4266_s21  ;;  %3887 = vmatprep.mubr.msk.f32.mxu1 %vm2410_vm11, %v2382_v26  ;;  %v1074_v33 = vld [vmem:[#allocation2 + $0x1a1] sm:$0xff]  ;;  %v2187_v9 = vsel %vm2163_vm4, %v2154_v51, %v5412_v5 }
 0x2d1   : > { %v5449_v58 = vpop.permute.xlu0 %1187 }
 0x2d2   : > { %v5453_v13 = vpop.permute.xlu1 %1569  ;;  %3916 = vmatprep.mubr.msk.f32.mxu0 %vm331_vm1, %v2738_v21 }
 0x2d3   : > { %1837 = vrot.lane.b32.xlu0 %v1040_v16, %s4270_s23  ;;  %3917 = vmatmul.mubr.msk.f32.gmra.mrb[6].mxu0 %vm331_vm1, %v2739_v52  ;;  %v2220_v52 = vsel %vm2196_vm5, %v2187_v9, %v5425_v34 }
 0x2d4   : > { %1963 = vrot.lane.b32.xlu1 %v1071_v1, %s4269_s16  ;;  %v2253_v25 = vsel %vm2229_vm6, %v2220_v52, %v5453_v13 }
 0x2d5   : > { %v1696_v11 = vpop.permute.xlu0 %1695 }
 0x2d6   : > { %v2078_v30 = vpop.permute.xlu1 %2077  ;;  %v2285_v20 = vsel %vm2262_vm7, %v2252_v56, %v1696_v11 }
 0x2d7   : > { %v2383_v4 = vsel %vm2361_vm10, %v2350_v42, %v2078_v30  ;;  %1457 = vrot.lane.b32.xlu0 %v1040_v16, %s4266_s21  ;;  %s323_s21 = sand.u32 1, %s4252_s10  }
 0x2d8   : > { %1583 = vrot.lane.b32.xlu1 %v1071_v1, %s4265_s17  ;;  %3888 = vmatmul.mubr.msk.f32.gmra.mrb[52].mxu1 %vm2410_vm11, %v2383_v4  ;;  %s3505_s24 = sshll.u32 %s323_s21, 8  ;;  %s5860_s13 = scalar_lea.sflag [#allocation4], %s323_s21 }
 0x2d9   : > { %v5468_v61 = vpop.permute.xlu0 %1189 }
 0x2da   : > { %v5470_v44 = vpop.permute.xlu1 %1315 }
 0x2db   : > { %1965 = vrot.lane.b32.xlu0 %v1072_v55, %s4269_s16 }
 0x2dc   : > { %2091 = vrot.lane.b32.xlu1 %v1103_v17, %s5916_s26 }
 0x2dd   : > { %v1698_v22 = vpop.permute.xlu0 %1697 }
 0x2de   : > { %v1824_v10 = vpop.permute.xlu1 %1823  ;;  %v2286_v62 = vsel %vm2262_vm7, %v2253_v25, %v1698_v22 }
 0x2df   : > { %1585 = vrot.lane.b32.xlu0 %v1072_v55, %s4265_s17  ;;  %v2318_v40 = vsel %vm2295_vm8, %v2285_v20, %v1824_v10 }
 0x2e0   : > { %1711 = vrot.lane.b32.xlu1 %v1103_v17, %s4267_s22  ;;  %v2155_v17 = vsel %vm331_vm1, %v5140_v12, %v5449_v58 }
 0x2e1   : > { %v5476_v23 = vpop.permute.xlu0 %1317  ;;  %v2188_v22 = vsel %vm2163_vm4, %v2155_v17, %v5470_v44 }
 0x2e2   : > { %v5478_v45 = vpop.permute.xlu1 %1443 }
 0x2e3   : > { %2093 = vrot.lane.b32.xlu0 %v1104_v39, %s5916_s26 }
 0x2e4   : > { %1713 = vrot.lane.b32.xlu1 %v1104_v39, %s4267_s22  ;;  %v2221_v39 = vsel %vm2196_vm5, %v2188_v22, %v5478_v45  ;;  %v2156_v45 = vsel %vm331_vm1, %v5167_v63, %v5468_v61  ;;  %s5850_s22 = scalar_lea.hbm %s5911_s9, %s3648_s25 }
 0x2e5   : > { %v1826_v0 = vpop.permute.xlu0 %1825  ;;  %v2189_v56 = vsel %vm2163_vm4, %v2156_v45, %v5476_v23 }
 0x2e6   : > { %v1952_v6 = vpop.permute.xlu1 %1951  ;;  %v2319_v16 = vsel %vm2295_vm8, %v2286_v62, %v1826_v0 }
 0x2e7   : > { %1839 = vrot.lane.b32.xlu0 %v1041_v53, %s4270_s23  ;;  %v2351_v28 = vsel %vm2328_vm9, %v2318_v40, %v1952_v6 }
 0x2e8   : > { %1841 = vrot.lane.b32.xlu1 %v1042_v32, %s4270_s23 }
 0x2e9   : > { %v5489_v31 = vpop.permute.xlu0 %1445 }
 0x2ea   : > { %v1572_v37 = vpop.permute.xlu1 %1571 }
 0x2eb   : > { %1967 = vrot.lane.b32.xlu0 %v1073_v15, %s4269_s16  ;;  %v2254_v0 = vsel %vm2229_vm6, %v2221_v39, %v1572_v37 }
 0x2ec   : > { %1969 = vrot.lane.b32.xlu1 %v1074_v33, %s4269_s16  ;;  %v3871_v48 = vpop.f32.mrb[40].mxu1  ;;  %s4271_s16 = smov [#allocation3]  }
 0x2ed   : > { %v2619_v59 = vadd.f32 %v3871_v48, %v5219_v18  ;;  %v1954_v3 = vpop.permute.xlu0 %1953  ;;  %v2613_v43 = vpop.f32.mrb[41].mxu1 }
 0x2ee   : > { %v2614_v7 = vadd.f32 %v5219_v18, %v2613_v43  ;;  %v2080_v47 = vpop.permute.xlu1 %2079  ;;  %v2352_v5 = vsel %vm2328_vm9, %v2319_v16, %v1954_v3 }
 0x2ef   : > { %v2384_v46 = vsel %vm2361_vm10, %v2351_v28, %v2080_v47  ;;  %2095 = vrot.lane.b32.xlu0 %v1105_v2, %s5916_s26  ;;  %v2741_v21 = vmax.f32 %v2619_v59, 0.0  ;;  %v2222_v2 = vsel %vm2196_vm5, %v2189_v56, %v5489_v31 }
 0x2f0   : > { %v2740_v26 = vmax.f32 %v2614_v7, 0.0  ;;  %2097 = vrot.lane.b32.xlu1 %v1106_v27, %s5916_s26  ;;  %3890 = vmatprep.mubr.msk.f32.mxu1 %vm2410_vm11, %v2384_v46  ;;  %s4202_s26 = sshll.u32 %s4271_s16, 4  ;;  %s4203_s26 = int_to_ptr.vmem [resolvable:$false] %s4202_s26 }
 0x2f1   : > { %v5511_v14 = vpop.permute.xlu0 %1191 }
 0x2f2   : > { %v1574_v38 = vpop.permute.xlu1 %1573  ;;  %3919 = vmatprep.mubr.msk.f32.mxu0 %vm331_vm1, %v2740_v26 }
 0x2f3   : > { %3920 = vmatmul.mubr.msk.f32.gmra.mrb[8].mxu0 %vm331_vm1, %v2741_v21  ;;  %v2255_v59 = vsel %vm2229_vm6, %v2222_v2, %v1574_v38  ;;  %v2157_v21 = vsel %vm331_vm1, %v5208_v19, %v5511_v14 }
 0x2f5   : > { %v1700_v60 = vpop.permute.xlu0 %1699 }
 0x2f6   : > { %v2082_v1 = vpop.permute.xlu1 %2081  ;;  %v2287_v32 = vsel %vm2262_vm7, %v2254_v0, %v1700_v60 }
 0x2f7   : > { %v2385_v57 = vsel %vm2361_vm10, %v2352_v5, %v2082_v1 }
 0x2f8   : > { %3891 = vmatmul.mubr.msk.f32.gmra.mrb[54].mxu1 %vm2410_vm11, %v2385_v57 }
 0x2f9   : > { %v5524_v34 = vpop.permute.xlu0 %1193 }
 0x2fa   : > { %v1320_v49 = vpop.permute.xlu1 %1319 }
 0x2fb   : > { %v2190_v52 = vsel %vm2163_vm4, %v2157_v21, %v1320_v49 }
 0x2fd   : > { %v1702_v11 = vpop.permute.xlu0 %1701 }
 0x2fe   : > { %v1828_v42 = vpop.permute.xlu1 %1827  ;;  %v2288_v63 = vsel %vm2262_vm7, %v2255_v59, %v1702_v11 }
 0x2ff   : > { %v2320_v36 = vsel %vm2295_vm8, %v2287_v32, %v1828_v42 }
 0x301   : > { %v5526_v13 = vpop.permute.xlu0 %1321 }
 0x302   : > { %v1448_v30 = vpop.permute.xlu1 %1447 }
 0x303   : > { %v2223_v25 = vsel %vm2196_vm5, %v2190_v52, %v1448_v30  ;;  %v2158_v30 = vsel %vm331_vm1, %v5247_v41, %v5524_v34 }
 0x304   : > { %v2191_v17 = vsel %vm2163_vm4, %v2158_v30, %v5526_v13 }
 0x305   : > { %v1830_v4 = vpop.permute.xlu0 %1829 }
 0x306   : > { %v1956_v55 = vpop.permute.xlu1 %1955  ;;  %v2321_v61 = vsel %vm2295_vm8, %v2288_v63, %v1830_v4 }
 0x307   : > { %v2353_v58 = vsel %vm2328_vm9, %v2320_v36, %v1956_v55 }
 0x309   : > { %v5533_v10 = vpop.permute.xlu0 %1449 }
 0x30a   : > { %v1576_v53 = vpop.permute.xlu1 %1575 }
 0x30b   : > { %v2256_v16 = vsel %vm2229_vm6, %v2223_v25, %v1576_v53  ;;  %v2224_v53 = vsel %vm2196_vm5, %v2191_v17, %v5533_v10 }
 0x30c   : > { %v3874_v6 = vpop.f32.mrb[42].mxu1 }
 0x30d   : > { %v2629_v15 = vadd.f32 %v3874_v6, %v5219_v18  ;;  %v1958_v54 = vpop.permute.xlu0 %1957  ;;  %v2623_v12 = vpop.f32.mrb[43].mxu1 }
 0x30e   : > { %v2624_v44 = vadd.f32 %v5219_v18, %v2623_v12  ;;  %v2084_v33 = vpop.permute.xlu1 %2083  ;;  %v2354_v23 = vsel %vm2328_vm9, %v2321_v61, %v1958_v54 }
 0x30f   : > { %v2386_v35 = vsel %vm2361_vm10, %v2353_v58, %v2084_v33  ;;  %v2743_v20 = vmax.f32 %v2629_v15, 0.0 }
 0x310   : > { %v2742_v37 = vmax.f32 %v2624_v44, 0.0  ;;  %3893 = vmatprep.mubr.msk.f32.mxu1 %vm2410_vm11, %v2386_v35 }
 0x311   : > { %v5550_v48 = vpop.permute.xlu0 %1195 }
 0x312   : > { %v1578_v40 = vpop.permute.xlu1 %1577  ;;  %3922 = vmatprep.mubr.msk.f32.mxu0 %vm331_vm1, %v2742_v37  ;;  %v2159_v37 = vsel %vm331_vm1, %v5283_v50, %v5550_v48 }
 0x313   : > { %3923 = vmatmul.mubr.msk.f32.gmra.mrb[10].mxu0 %vm331_vm1, %v2743_v20  ;;  %v2257_v32 = vsel %vm2229_vm6, %v2224_v53, %v1578_v40 }
 0x315   : > { %v1704_v3 = vpop.permute.xlu0 %1703 }
 0x316   : > { %v2086_v43 = vpop.permute.xlu1 %2085  ;;  %v2289_v60 = vsel %vm2262_vm7, %v2256_v16, %v1704_v3 }
 0x317   : > { %v2387_v27 = vsel %vm2361_vm10, %v2354_v23, %v2086_v43 }
 0x318   : > { %3894 = vmatmul.mubr.msk.f32.gmra.mrb[56].mxu1 %vm2410_vm11, %v2387_v27 }
 0x319   : > { %v5562_v31 = vpop.permute.xlu0 %1197 }
 0x31a   : > { %v1324_v28 = vpop.permute.xlu1 %1323 }
 0x31b   : > { %v2192_v56 = vsel %vm2163_vm4, %v2159_v37, %v1324_v28  ;;  %v2160_v28 = vsel %vm331_vm1, %v5316_v8, %v5562_v31 }
 0x31d   : > { %v1706_v7 = vpop.permute.xlu0 %1705 }
 0x31e   : > { %v1832_v47 = vpop.permute.xlu1 %1831  ;;  %v2290_v41 = vsel %vm2262_vm7, %v2257_v32, %v1706_v7 }
 0x31f   : > { %v2322_v1 = vsel %vm2295_vm8, %v2289_v60, %v1832_v47 }
 0x321   : > { %v5564_v46 = vpop.permute.xlu0 %1325 }
 0x322   : > { %v1452_v51 = vpop.permute.xlu1 %1451 }
 0x323   : > { %v2225_v2 = vsel %vm2196_vm5, %v2192_v56, %v1452_v51 }
 0x325   : > { %v1834_v26 = vpop.permute.xlu0 %1833 }
 0x326   : > { %v1960_v9 = vpop.permute.xlu1 %1959  ;;  %v2323_v34 = vsel %vm2295_vm8, %v2290_v41, %v1834_v26  ;;  %v2193_v26 = vsel %vm2163_vm4, %v2160_v28, %v5564_v46 }
 0x327   : > { %v2355_v4 = vsel %vm2328_vm9, %v2322_v1, %v1960_v9 }
 0x329   : > { %v1454_v38 = vpop.permute.xlu0 %1453 }
 0x32a   : > { %v1580_v62 = vpop.permute.xlu1 %1579  ;;  %v2226_v21 = vsel %vm2196_vm5, %v2193_v26, %v1454_v38 }
 0x32b   : > { %v2258_v59 = vsel %vm2229_vm6, %v2225_v2, %v1580_v62 }
 0x32c   : > { %v3877_v5 = vpop.f32.mrb[44].mxu1 }
 0x32d   : > { %v2639_v57 = vadd.f32 %v3877_v5, %v5219_v18  ;;  %v1962_v11 = vpop.permute.xlu0 %1961  ;;  %v2633_v42 = vpop.f32.mrb[45].mxu1 }
 0x32e   : > { %v2634_v19 = vadd.f32 %v5219_v18, %v2633_v42  ;;  %v2088_v14 = vpop.permute.xlu1 %2087  ;;  %v2356_v36 = vsel %vm2328_vm9, %v2323_v34, %v1962_v11 }
 0x32f   : > { %v2388_v49 = vsel %vm2361_vm10, %v2355_v4, %v2088_v14  ;;  %v2745_v22 = vmax.f32 %v2639_v57, 0.0 }
 0x330   : > { %v2744_v55 = vmax.f32 %v2634_v19, 0.0  ;;  %3896 = vmatprep.mubr.msk.f32.mxu1 %vm2410_vm11, %v2388_v49 }
 0x331   : > { %v1200_v39 = vpop.permute.xlu0 %1199 }
 0x332   : > { %v1582_v0 = vpop.permute.xlu1 %1581  ;;  %3925 = vmatprep.mubr.msk.f32.mxu0 %vm331_vm1, %v2744_v55  ;;  %v2161_v57 = vsel %vm331_vm1, %v5355_v24, %v1200_v39 }
 0x333   : > { %3926 = vmatmul.mubr.msk.f32.gmra.mrb[12].mxu0 %vm331_vm1, %v2745_v22  ;;  %v2259_v25 = vsel %vm2229_vm6, %v2226_v21, %v1582_v0 }
 0x335   : > { %v1708_v6 = vpop.permute.xlu0 %1707 }
 0x336   : > { %v2090_v13 = vpop.permute.xlu1 %2089  ;;  %v2291_v61 = vsel %vm2262_vm7, %v2258_v59, %v1708_v6 }
 0x337   : > { %v2389_v15 = vsel %vm2361_vm10, %v2356_v36, %v2090_v13 }
 0x338   : > { %3897 = vmatmul.mubr.msk.f32.gmra.mrb[58].mxu1 %vm2410_vm11, %v2389_v15 }
 0x339   : > { %v1202_v10 = vpop.permute.xlu0 %1201 }
 0x33a   : > { %v1328_v54 = vpop.permute.xlu1 %1327  ;;  %v2162_v11 = vsel %vm331_vm1, %v5388_v29, %v1202_v10 }
 0x33b   : > { %v2194_v42 = vsel %vm2163_vm4, %v2161_v57, %v1328_v54 }
 0x33d   : > { %v1710_v12 = vpop.permute.xlu0 %1709 }
 0x33e   : > { %v1836_v58 = vpop.permute.xlu1 %1835  ;;  %v2292_v8 = vsel %vm2262_vm7, %v2259_v25, %v1710_v12 }
 0x33f   : > { %v2324_v43 = vsel %vm2295_vm8, %v2291_v61, %v1836_v58  ;;  %v3093_v58 = vld [vmem:[%s5909_s7] sm:$0xf] }
 0x340   : > { %3955 = vmatprep.subr.msk.mxu0 %vm524_vm0, %v3093_v58 }
 0x341   : > { %v1330_v44 = vpop.permute.xlu0 %1329  ;;  %3956 = vmatpush3.msk.msra.mxu0 %vm524_vm0, %v3093_v58  ;;  %v4187_v58 = vld [vmem:[%s4438_s27 + $0xa8] sm:$0xff] }
 0x342   : > { %v1456_v33 = vpop.permute.xlu1 %1455  ;;  %v2195_v4 = vsel %vm2163_vm4, %v2162_v11, %v1330_v44 }
 0x343   : > { %v2227_v19 = vsel %vm2196_vm5, %v2194_v42, %v1456_v33 }
 0x345   : > { %v1838_v35 = vpop.permute.xlu0 %1837 }
 0x346   : > { %v1964_v45 = vpop.permute.xlu1 %1963  ;;  %v2325_v31 = vsel %vm2295_vm8, %v2292_v8, %v1838_v35 }
 0x347   : > { %v2357_v50 = vsel %vm2328_vm9, %v2324_v43, %v1964_v45 }
 0x349   : > { %v1458_v20 = vpop.permute.xlu0 %1457 }
 0x34a   : > { %v1584_v40 = vpop.permute.xlu1 %1583  ;;  %v2228_v49 = vsel %vm2196_vm5, %v2195_v4, %v1458_v20 }
 0x34b   : > { %v3880_v63 = vpop.f32.mrb[46].mxu1  ;;  %v2260_v30 = vsel %vm2229_vm6, %v2227_v19, %v1584_v40 }
 0x34c   : > { %v2649_v3 = vadd.f32 %v3880_v63, %v5219_v18  ;;  %v2643_v23 = vpop.f32.mrb[47].mxu1 }
 0x34d   : > { %v2644_v27 = vadd.f32 %v5219_v18, %v2643_v23  ;;  %v1966_v7 = vpop.permute.xlu0 %1965 }
 0x34e   : > { %v2092_v48 = vpop.permute.xlu1 %2091  ;;  %v2747_v9 = vmax.f32 %v2649_v3, 0.0  ;;  %v2358_v16 = vsel %vm2328_vm9, %v2325_v31, %v1966_v7 }
 0x34f   : > { %v2746_v47 = vmax.f32 %v2644_v27, 0.0  ;;  %v2390_v51 = vsel %vm2361_vm10, %v2357_v50, %v2092_v48 }
 0x350   : > { %3899 = vmatprep.mubr.msk.f32.mxu1 %vm2410_vm11, %v2390_v51 }
 0x351   : > { %v1586_v52 = vpop.permute.xlu0 %1585  ;;  %3928 = vmatprep.mubr.msk.f32.mxu0 %vm331_vm1, %v2746_v47 }
 0x352   : > { %v1712_v62 = vpop.permute.xlu1 %1711  ;;  %3929 = vmatmul.mubr.msk.f32.gmra.mrb[14].mxu0 %vm331_vm1, %v2747_v9  ;;  %v2261_v17 = vsel %vm2229_vm6, %v2228_v49, %v1586_v52  ;;  %v4166_v49 = vld [vmem:[%s4438_s27] sm:$0xff] }
 0x353   : > { %v2293_v22 = vsel %vm2262_vm7, %v2260_v30, %v1712_v62  ;;  %v4167_v30 = vld [vmem:[%s4438_s27 + $0x8] sm:$0xff] }
 0x355   : > { %v2094_v46 = vpop.permute.xlu0 %2093 }
 0x356   : > { %v2391_v60 = vsel %vm2361_vm10, %v2358_v16, %v2094_v46  ;;  %v1714_v5 = vpop.permute.xlu1 %1713 }
 0x357   : > { %3900 = vmatmul.mubr.msk.f32.gmra.mrb[60].mxu1 %vm2410_vm11, %v2391_v60  ;;  %v2294_v24 = vsel %vm2262_vm7, %v2261_v17, %v1714_v5  ;;  %v4170_v17 = vld [vmem:[%s4438_s27 + $0x20] sm:$0xff] }
 0x359   : > { %v1840_v38 = vpop.permute.xlu0 %1839 }
 0x35a   : > { %v1842_v1 = vpop.permute.xlu1 %1841  ;;  %v2326_v29 = vsel %vm2295_vm8, %v2293_v22, %v1840_v38  ;;  %v4171_v22 = vld [vmem:[%s4438_s27 + $0x28] sm:$0xff] }
 0x35b   : > { %v2327_v39 = vsel %vm2295_vm8, %v2294_v24, %v1842_v1  ;;  %v4172_v24 = vld [vmem:[%s4438_s27 + $0x30] sm:$0xff] }
 0x35d   : > { %v1968_v14 = vpop.permute.xlu0 %1967 }
 0x35e   : > { %v1970_v55 = vpop.permute.xlu1 %1969  ;;  %v2359_v53 = vsel %vm2328_vm9, %v2326_v29, %v1968_v14  ;;  %v4173_v29 = vld [vmem:[%s4438_s27 + $0x38] sm:$0xff] }
 0x35f   : > { %v2360_v32 = vsel %vm2328_vm9, %v2327_v39, %v1970_v55  ;;  %v4168_v55 = vld [vmem:[%s4438_s27 + $0x10] sm:$0xff]  ;;  %v4174_v39 = vld [vmem:[%s4438_s27 + $0x40] sm:$0xff] }
 0x361   : > { %v2096_v0 = vpop.permute.xlu0 %2095 }
 0x362   : > { %v2392_v41 = vsel %vm2361_vm10, %v2359_v53, %v2096_v0  ;;  %v2098_v34 = vpop.permute.xlu1 %2097  ;;  %v4175_v53 = vld [vmem:[%s4438_s27 + $0x48] sm:$0xff]  ;;  %v4176_v0 = vld [vmem:[%s4438_s27 + $0x50] sm:$0xff] }
 0x363   : > { %v2393_v6 = vsel %vm2361_vm10, %v2360_v32, %v2098_v34  ;;  %3902 = vmatprep.mubr.msk.f32.mxu1 %vm2410_vm11, %v2392_v41  ;;  %v4177_v32 = vld [vmem:[%s4438_s27 + $0x58] sm:$0xff]  ;;  %v4178_v41 = vld [vmem:[%s4438_s27 + $0x60] sm:$0xff]  ;;  %v4179_v34 = vld [vmem:[%s4438_s27 + $0x68] sm:$0xff] }
 0x364   : > { %3903 = vmatmul.mubr.msk.f32.gmra.mrb[62].mxu1 %vm2410_vm11, %v2393_v6  ;;  %v4180_v6 = vld [vmem:[%s4438_s27 + $0x70] sm:$0xff] }
 0x36b   : > { %v3883_v36 = vpop.f32.mrb[48].mxu1 }
 0x36c   : > { %v2659_v13 = vadd.f32 %v3883_v36, %v5219_v18  ;;  %v2653_v15 = vpop.f32.mrb[49].mxu1  ;;  %v4181_v36 = vld [vmem:[%s4438_s27 + $0x78] sm:$0xff] }
 0x36d   : > { %v2654_v10 = vadd.f32 %v5219_v18, %v2653_v15  ;;  %v4183_v15 = vld [vmem:[%s4438_s27 + $0x88] sm:$0xff] }
 0x36e   : > { %v2749_v12 = vmax.f32 %v2659_v13, 0.0  ;;  %v4182_v13 = vld [vmem:[%s4438_s27 + $0x80] sm:$0xff] }
 0x36f   : > { %v2748_v54 = vmax.f32 %v2654_v10, 0.0  ;;  %v4184_v10 = vld [vmem:[%s4438_s27 + $0x90] sm:$0xff] }
 0x371   : > { %3931 = vmatprep.mubr.msk.f32.mxu0 %vm331_vm1, %v2748_v54  ;;  %v4185_v54 = vld [vmem:[%s4438_s27 + $0x98] sm:$0xff] }
 0x372   : > { %3932 = vmatmul.mubr.msk.f32.gmra.mrb[16].mxu0 %vm331_vm1, %v2749_v12  ;;  %v4186_v12 = vld [vmem:[%s4438_s27 + $0xa0] sm:$0xff] }
 0x38b   : > { %v3886_v44 = vpop.f32.mrb[50].mxu1 }
 0x38c   : > { %v2669_v33 = vadd.f32 %v3886_v44, %v5219_v18  ;;  %v2663_v35 = vpop.f32.mrb[51].mxu1  ;;  %v4188_v44 = vld [vmem:[%s4438_s27 + $0xb0] sm:$0xff] }
 0x38d   : > { %v2664_v45 = vadd.f32 %v5219_v18, %v2663_v35  ;;  %v4190_v35 = vld [vmem:[%s4438_s27 + $0xc0] sm:$0xff] }
 0x38e   : > { %v2751_v56 = vmax.f32 %v2669_v33, 0.0  ;;  %v4189_v33 = vld [vmem:[%s4438_s27 + $0xb8] sm:$0xff] }
 0x38f   : > { %v2750_v37 = vmax.f32 %v2664_v45, 0.0  ;;  %v4191_v45 = vld [vmem:[%s4438_s27 + $0xc8] sm:$0xff] }
 0x391   : > { %3934 = vmatprep.mubr.msk.f32.mxu0 %vm331_vm1, %v2750_v37  ;;  %v4192_v37 = vld [vmem:[%s4438_s27 + $0xd0] sm:$0xff] }
 0x392   : > { %3935 = vmatmul.mubr.msk.f32.gmra.mrb[18].mxu0 %vm331_vm1, %v2751_v56  ;;  %v4193_v56 = vld [vmem:[%s4438_s27 + $0xd8] sm:$0xff] }
 0x3ab   : > { %v3889_v20 = vpop.f32.mrb[52].mxu1 }
 0x3ac   : > { %v2679_v2 = vadd.f32 %v3889_v20, %v5219_v18  ;;  %v2673_v40 = vpop.f32.mrb[53].mxu1  ;;  %v4194_v20 = vld [vmem:[%s4438_s27 + $0xe0] sm:$0xff] }
 0x3ad   : > { %v2674_v59 = vadd.f32 %v5219_v18, %v2673_v40  ;;  %v4196_v40 = vld [vmem:[%s4438_s27 + $0xf0] sm:$0xff] }
 0x3ae   : > { %v2753_v61 = vmax.f32 %v2679_v2, 0.0  ;;  %v4195_v2 = vld [vmem:[%s4438_s27 + $0xe8] sm:$0xff] }
 0x3af   : > { %v2752_v63 = vmax.f32 %v2674_v59, 0.0  ;;  %v4197_v59 = vld [vmem:[%s4438_s27 + $0xf8] sm:$0xff] }
 0x3b1   : > { %3937 = vmatprep.mubr.msk.f32.mxu0 %vm331_vm1, %v2752_v63  ;;  %v3575_v63 = vld [vmem:[%s5908_s6] ss:$0 sm:$0xff] }
 0x3b2   : > { %3938 = vmatmul.mubr.msk.f32.gmra.mrb[20].mxu0 %vm331_vm1, %v2753_v61  ;;  %v3608_v61 = vld [vmem:[%s5910_s8] ss:$0 sm:$0xff] }
 0x3cb   : > { %v3892_v3 = vpop.f32.mrb[54].mxu1 }
 0x3cc   : > { %v2689_v23 = vadd.f32 %v3892_v3, %v5219_v18  ;;  %v2683_v43 = vpop.f32.mrb[55].mxu1 }
 0x3cd   : > { %v2684_v27 = vadd.f32 %v5219_v18, %v2683_v43  ;;  %v5751_v43 = vadd.f32 %v3608_v61, %v3575_v63 }
 0x3ce   : > { %v2755_v50 = vmax.f32 %v2689_v23, 0.0 }
 0x3cf   : > { %v2754_v7 = vmax.f32 %v2684_v27, 0.0 }
 0x3d1   : > { %3940 = vmatprep.mubr.msk.f32.mxu0 %vm331_vm1, %v2754_v7 }
 0x3d2   : > { %3941 = vmatmul.mubr.msk.f32.gmra.mrb[22].mxu0 %vm331_vm1, %v2755_v50 }
 0x3eb   : > { %v3895_v48 = vpop.f32.mrb[56].mxu1 }
 0x3ec   : > { %v2699_v28 = vadd.f32 %v3895_v48, %v5219_v18  ;;  %v2693_v47 = vpop.f32.mrb[57].mxu1 }
 0x3ed   : > { %v2694_v51 = vadd.f32 %v5219_v18, %v2693_v47 }
 0x3ee   : > { %v2757_v9 = vmax.f32 %v2699_v28, 0.0 }
 0x3ef   : > { %v2756_v26 = vmax.f32 %v2694_v51, 0.0 }
 0x3f1   : > { %3943 = vmatprep.mubr.msk.f32.mxu0 %vm331_vm1, %v2756_v26 }
 0x3f2   : > { %3944 = vmatmul.mubr.msk.f32.gmra.mrb[24].mxu0 %vm331_vm1, %v2757_v9 }
 0x40b   : > { %v3898_v21 = vpop.f32.mrb[58].mxu1 }
 0x40c   : > { %v2709_v52 = vadd.f32 %v3898_v21, %v5219_v18  ;;  %v2703_v25 = vpop.f32.mrb[59].mxu1 }
 0x40d   : > { %v2704_v62 = vadd.f32 %v5219_v18, %v2703_v25 }
 0x40e   : > { %v2759_v31 = vmax.f32 %v2709_v52, 0.0 }
 0x40f   : > { %v2758_v8 = vmax.f32 %v2704_v62, 0.0 }
 0x411   : > { %3946 = vmatprep.mubr.msk.f32.mxu0 %vm331_vm1, %v2758_v8 }
 0x412   : > { %3947 = vmatmul.mubr.msk.f32.gmra.mrb[26].mxu0 %vm331_vm1, %v2759_v31 }
 0x42a   : > { %v3901_v16 = vpop.f32.mrb[60].mxu1 }
 0x42b   : > { %v2719_v46 = vadd.f32 %v3901_v16, %v5219_v18  ;;  %v2713_v60 = vpop.f32.mrb[61].mxu1 }
 0x42c   : > { %v2714_v5 = vadd.f32 %v5219_v18, %v2713_v60 }
 0x42d   : > { %v2761_v1 = vmax.f32 %v2719_v46, 0.0 }
 0x42e   : > { %v2760_v38 = vmax.f32 %v2714_v5, 0.0 }
 0x430   : > { %3949 = vmatprep.mubr.msk.f32.mxu0 %vm331_vm1, %v2760_v38 }
 0x431   : > { %3950 = vmatmul.mubr.msk.f32.gmra.mrb[28].mxu0 %vm331_vm1, %v2761_v1 }
 0x437   : > { %v3904_v57 = vpop.f32.mrb[62].mxu1 }
 0x438   : > { %v2729_v11 = vadd.f32 %v3904_v57, %v5219_v18  ;;  %v2723_v42 = vpop.f32.mrb[63].mxu1 }
 0x439   : > { %v2724_v4 = vadd.f32 %v5219_v18, %v2723_v42  ;;  %v4169_v18 = vld [vmem:[%s4438_s27 + $0x18] sm:$0xff]  ;;  %s5755_s27 = scalar_lea.vmem [#allocation3], %s3505_s24  ;;  %s4204_s24 = scalar_lea.vmem %s4203_s26, 8192 }
 0x43a   : > { %v2763_v14 = vmax.f32 %v2729_v11, 0.0  ;;  %s3439_s14 = sshll.u32 %s5755_s27, 4  ;;  %s5852_s14 = int_to_ptr.vmem [resolvable:$true] %s3439_s14 }
 0x43b   : > { %v2762_v19 = vmax.f32 %v2724_v4, 0.0  ;;  %s4198_s23 = scalar_lea.vmem %s5852_s14, 4096  ;;  %p4205_p0 = scmp.lt.s32.totalorder %s5852_s14, %s4203_s26 }
 0x43c   : > { %p4199_p11 = scmp.ne.s32.totalorder %s5852_s14, %s4198_s23  ;;  %p4206_p1 = scmp.lt.s32.totalorder %s4204_s24, %s4198_s23 }
 0x43d   : > { %3952 = vmatprep.mubr.msk.f32.mxu0 %vm331_vm1, %v2762_v19 }
 0x43e   : > { %3953 = vmatmul.mubr.msk.f32.gmra.mrb[30].mxu0 %vm331_vm1, %v2763_v14  ;;  %p4200_p12 = pnand %p4199_p11, %p4361_p5  ;;  %p4207_p2 = por %p4206_p1, %p4205_p0 }
 0x43f   : > { %3957 = vmatprep.mubr.msk.f32.mxu0 %vm427_vm3, %v4166_v49 }
 0x440   : > { %p4201_p13 = pneg %p4200_p12 }
 0x442   : > { %3958 = vmatmul.mubr.msk.f32.vlgmr.msra.gmra.mrb[0].mxu0 %vm427_vm3, %v4167_v30  ;;  %p4208_p3 = pnand %p4207_p2, %p4201_p13 }
 0x443   : > { %3960 = vmatprep.mubr.msk.f32.mxu0 %vm427_vm3, %v4168_v55 }
 0x446   : > { %3961 = vmatmul.mubr.msk.f32.gmra.mrb[2].mxu0 %vm427_vm3, %v4169_v18 }
 0x447   : > { %3963 = vmatprep.mubr.msk.f32.mxu0 %vm427_vm3, %v4170_v17 }
 0x44a   : > { %3964 = vmatmul.mubr.msk.f32.gmra.mrb[4].mxu0 %vm427_vm3, %v4171_v22 }
 0x44b   : > { %3966 = vmatprep.mubr.msk.f32.mxu0 %vm427_vm3, %v4172_v24 }
 0x44e   : > { %3967 = vmatmul.mubr.msk.f32.gmra.mrb[6].mxu0 %vm427_vm3, %v4173_v29 }
 0x44f   : > { %3969 = vmatprep.mubr.msk.f32.mxu0 %vm427_vm3, %v4174_v39 }
 0x452   : > { %3970 = vmatmul.mubr.msk.f32.gmra.mrb[8].mxu0 %vm427_vm3, %v4175_v53 }
 0x453   : > { %3972 = vmatprep.mubr.msk.f32.mxu0 %vm427_vm3, %v4176_v0 }
 0x456   : > { %3973 = vmatmul.mubr.msk.f32.gmra.mrb[10].mxu0 %vm427_vm3, %v4177_v32 }
 0x457   : > { %3975 = vmatprep.mubr.msk.f32.mxu0 %vm427_vm3, %v4178_v41 }
 0x45a   : > { %3976 = vmatmul.mubr.msk.f32.gmra.mrb[12].mxu0 %vm427_vm3, %v4179_v34 }
 0x45b   : > { %3978 = vmatprep.mubr.msk.f32.mxu0 %vm427_vm3, %v4180_v6 }
 0x45e   : > { %3979 = vmatmul.mubr.msk.f32.gmra.mrb[14].mxu0 %vm427_vm3, %v4181_v36 }
 0x45f   : > { %3981 = vmatprep.mubr.msk.f32.mxu0 %vm427_vm3, %v4182_v13 }
 0x462   : > { %3982 = vmatmul.mubr.msk.f32.gmra.mrb[16].mxu0 %vm427_vm3, %v4183_v15 }
 0x463   : > { %3984 = vmatprep.mubr.msk.f32.mxu0 %vm427_vm3, %v4184_v10 }
 0x466   : > { %3985 = vmatmul.mubr.msk.f32.gmra.mrb[18].mxu0 %vm427_vm3, %v4185_v54 }
 0x467   : > { %3987 = vmatprep.mubr.msk.f32.mxu0 %vm427_vm3, %v4186_v12 }
 0x46a   : > { %3988 = vmatmul.mubr.msk.f32.gmra.mrb[20].mxu0 %vm427_vm3, %v4187_v58 }
 0x46b   : > { %3990 = vmatprep.mubr.msk.f32.mxu0 %vm427_vm3, %v4188_v44 }
 0x46e   : > { %3991 = vmatmul.mubr.msk.f32.gmra.mrb[22].mxu0 %vm427_vm3, %v4189_v33 }
 0x46f   : > { %3993 = vmatprep.mubr.msk.f32.mxu0 %vm427_vm3, %v4190_v35 }
 0x472   : > { %3994 = vmatmul.mubr.msk.f32.gmra.mrb[24].mxu0 %vm427_vm3, %v4191_v45 }
 0x473   : > { %3996 = vmatprep.mubr.msk.f32.mxu0 %vm427_vm3, %v4192_v37 }
 0x476   : > { %3997 = vmatmul.mubr.msk.f32.gmra.mrb[26].mxu0 %vm427_vm3, %v4193_v56 }
 0x477   : > { %3999 = vmatprep.mubr.msk.f32.mxu0 %vm427_vm3, %v4194_v20 }
 0x47a   : > { %4000 = vmatmul.mubr.msk.f32.gmra.mrb[28].mxu0 %vm427_vm3, %v4195_v2 }
 0x47b   : > { %4002 = vmatprep.mubr.msk.f32.mxu0 %vm427_vm3, %v4196_v40 }
 0x47e   : > { %4003 = vmatmul.mubr.msk.f32.gmra.mrb[30].mxu0 %vm427_vm3, %v4197_v59 }
 0x515   : > { %v3959_v3 = vpop.f32.mrb[0].mxu0 }
 0x516   : > { %v4021_v23 = vadd.f32 %v3959_v3, %v3575_v63  ;;  %v3170_v27 = vpop.f32.mrb[1].mxu0 }
 0x517   : > { %v4023_v7 = vadd.f32 %v3575_v63, %v3170_v27 }
 0x518   : > { %v4022_v50 = vadd.f32 %v4021_v23, %v3608_v61 }
 0x519   : > { %v4024_v48 = vadd.f32 %v4023_v7, %v3608_v61  ;;  %v3962_v28 = vpop.f32.mrb[2].mxu0 }
 0x51a   : > { %v3362_v47 = vmax.f32 %v4022_v50, 0.0  ;;  %v4026_v51 = vadd.f32 %v5751_v43, %v3962_v28  ;;  %v3180_v26 = vpop.f32.mrb[3].mxu0 }
 0x51b   : > { %v3361_v9 = vmax.f32 %v4024_v48, 0.0  ;;  %v4028_v21 = vadd.f32 %v5751_v43, %v3180_v26 }
 0x51c   : > { %3394 = vst.msk [vmem:[%s5755_s27 + $0x8] sm:$0xff] %vm2229_vm6, %v3362_v47  ;;  %v3364_v52 = vmax.f32 %v4026_v51, 0.0 }
 0x51d   : > { %3393 = vst.msk [vmem:[%s5755_s27] sm:$0xff] %vm2229_vm6, %v3361_v9  ;;  %v3363_v25 = vmax.f32 %v4028_v21, 0.0  ;;  %v3965_v62 = vpop.f32.mrb[4].mxu0 }
 0x51e   : > { %3396 = vst.msk [vmem:[%s5755_s27 + $0x18] sm:$0xff] %vm2229_vm6, %v3364_v52  ;;  %v4030_v8 = vadd.f32 %v5751_v43, %v3965_v62  ;;  %v3190_v31 = vpop.f32.mrb[5].mxu0 }
 0x51f   : > { %3395 = vst.msk [vmem:[%s5755_s27 + $0x10] sm:$0xff] %vm2229_vm6, %v3363_v25  ;;  %v4032_v16 = vadd.f32 %v5751_v43, %v3190_v31 }
 0x520   : > { %v3366_v46 = vmax.f32 %v4030_v8, 0.0 }
 0x521   : > { %v3365_v60 = vmax.f32 %v4032_v16, 0.0  ;;  %v3968_v5 = vpop.f32.mrb[6].mxu0 }
 0x522   : > { %3398 = vst.msk [vmem:[%s5755_s27 + $0x28] sm:$0xff] %vm2229_vm6, %v3366_v46  ;;  %v4034_v38 = vadd.f32 %v5751_v43, %v3968_v5  ;;  %v3200_v1 = vpop.f32.mrb[7].mxu0 }
 0x523   : > { %3397 = vst.msk [vmem:[%s5755_s27 + $0x20] sm:$0xff] %vm2229_vm6, %v3365_v60  ;;  %v4036_v57 = vadd.f32 %v5751_v43, %v3200_v1 }
 0x524   : > { %v3368_v11 = vmax.f32 %v4034_v38, 0.0 }
 0x525   : > { %v3367_v42 = vmax.f32 %v4036_v57, 0.0  ;;  %v3971_v4 = vpop.f32.mrb[8].mxu0 }
 0x526   : > { %3400 = vst.msk [vmem:[%s5755_s27 + $0x38] sm:$0xff] %vm2229_vm6, %v3368_v11  ;;  %v4038_v19 = vadd.f32 %v5751_v43, %v3971_v4  ;;  %v3210_v14 = vpop.f32.mrb[9].mxu0 }
 0x527   : > { %3399 = vst.msk [vmem:[%s5755_s27 + $0x30] sm:$0xff] %vm2229_vm6, %v3367_v42  ;;  %v4040_v49 = vadd.f32 %v5751_v43, %v3210_v14 }
 0x528   : > { %v3370_v30 = vmax.f32 %v4038_v19, 0.0 }
 0x529   : > { %v3369_v55 = vmax.f32 %v4040_v49, 0.0  ;;  %v3974_v18 = vpop.f32.mrb[10].mxu0 }
 0x52a   : > { %3402 = vst.msk [vmem:[%s5755_s27 + $0x48] sm:$0xff] %vm2229_vm6, %v3370_v30  ;;  %v4042_v17 = vadd.f32 %v5751_v43, %v3974_v18  ;;  %v3220_v22 = vpop.f32.mrb[11].mxu0 }
 0x52b   : > { %3401 = vst.msk [vmem:[%s5755_s27 + $0x40] sm:$0xff] %vm2229_vm6, %v3369_v55  ;;  %v4044_v24 = vadd.f32 %v5751_v43, %v3220_v22 }
 0x52c   : > { %v3372_v29 = vmax.f32 %v4042_v17, 0.0 }
 0x52d   : > { %v3371_v39 = vmax.f32 %v4044_v24, 0.0  ;;  %v3977_v53 = vpop.f32.mrb[12].mxu0 }
 0x52e   : > { %3404 = vst.msk [vmem:[%s5755_s27 + $0x58] sm:$0xff] %vm2229_vm6, %v3372_v29  ;;  %v4046_v0 = vadd.f32 %v5751_v43, %v3977_v53  ;;  %v3230_v32 = vpop.f32.mrb[13].mxu0 }
 0x52f   : > { %3403 = vst.msk [vmem:[%s5755_s27 + $0x50] sm:$0xff] %vm2229_vm6, %v3371_v39  ;;  %v4048_v41 = vadd.f32 %v5751_v43, %v3230_v32 }
 0x530   : > { %v3374_v34 = vmax.f32 %v4046_v0, 0.0 }
 0x531   : > { %v3373_v6 = vmax.f32 %v4048_v41, 0.0  ;;  %v3980_v36 = vpop.f32.mrb[14].mxu0 }
 0x532   : > { %3406 = vst.msk [vmem:[%s5755_s27 + $0x68] sm:$0xff] %vm2229_vm6, %v3374_v34  ;;  %v4050_v13 = vadd.f32 %v5751_v43, %v3980_v36  ;;  %v3240_v15 = vpop.f32.mrb[15].mxu0 }
 0x533   : > { %3405 = vst.msk [vmem:[%s5755_s27 + $0x60] sm:$0xff] %vm2229_vm6, %v3373_v6  ;;  %v4052_v10 = vadd.f32 %v5751_v43, %v3240_v15 }
 0x534   : > { %v3376_v54 = vmax.f32 %v4050_v13, 0.0 }
 0x535   : > { %v3375_v12 = vmax.f32 %v4052_v10, 0.0  ;;  %v3983_v58 = vpop.f32.mrb[16].mxu0 }
 0x536   : > { %3408 = vst.msk [vmem:[%s5755_s27 + $0x78] sm:$0xff] %vm2229_vm6, %v3376_v54  ;;  %v4054_v44 = vadd.f32 %v5751_v43, %v3983_v58  ;;  %v3250_v33 = vpop.f32.mrb[17].mxu0 }
 0x537   : > { %3407 = vst.msk [vmem:[%s5755_s27 + $0x70] sm:$0xff] %vm2229_vm6, %v3375_v12  ;;  %v4056_v35 = vadd.f32 %v5751_v43, %v3250_v33 }
 0x538   : > { %v3378_v45 = vmax.f32 %v4054_v44, 0.0 }
 0x539   : > { %v3377_v37 = vmax.f32 %v4056_v35, 0.0  ;;  %v3986_v56 = vpop.f32.mrb[18].mxu0 }
 0x53a   : > { %3410 = vst.msk [vmem:[%s5755_s27 + $0x88] sm:$0xff] %vm2229_vm6, %v3378_v45  ;;  %v4058_v20 = vadd.f32 %v5751_v43, %v3986_v56  ;;  %v3260_v2 = vpop.f32.mrb[19].mxu0 }
 0x53b   : > { %3409 = vst.msk [vmem:[%s5755_s27 + $0x80] sm:$0xff] %vm2229_vm6, %v3377_v37  ;;  %v4060_v40 = vadd.f32 %v5751_v43, %v3260_v2 }
 0x53c   : > { %v3380_v59 = vmax.f32 %v4058_v20, 0.0 }
 0x53d   : > { %v3379_v63 = vmax.f32 %v4060_v40, 0.0  ;;  %v3989_v61 = vpop.f32.mrb[20].mxu0 }
 0x53e   : > { %3412 = vst.msk [vmem:[%s5755_s27 + $0x98] sm:$0xff] %vm2229_vm6, %v3380_v59  ;;  %v4062_v3 = vadd.f32 %v5751_v43, %v3989_v61  ;;  %v3270_v23 = vpop.f32.mrb[21].mxu0 }
 0x53f   : > { %3411 = vst.msk [vmem:[%s5755_s27 + $0x90] sm:$0xff] %vm2229_vm6, %v3379_v63  ;;  %v4064_v27 = vadd.f32 %v5751_v43, %v3270_v23 }
 0x540   : > { %v3382_v7 = vmax.f32 %v4062_v3, 0.0 }
 0x541   : > { %v3381_v50 = vmax.f32 %v4064_v27, 0.0  ;;  %v3992_v48 = vpop.f32.mrb[22].mxu0 }
 0x542   : > { %3414 = vst.msk [vmem:[%s5755_s27 + $0xa8] sm:$0xff] %vm2229_vm6, %v3382_v7  ;;  %v4066_v28 = vadd.f32 %v5751_v43, %v3992_v48  ;;  %v3280_v47 = vpop.f32.mrb[23].mxu0 }
 0x543   : > { %3413 = vst.msk [vmem:[%s5755_s27 + $0xa0] sm:$0xff] %vm2229_vm6, %v3381_v50  ;;  %v4068_v51 = vadd.f32 %v5751_v43, %v3280_v47 }
 0x544   : > { %v3384_v26 = vmax.f32 %v4066_v28, 0.0 }
 0x545   : > { %v3383_v9 = vmax.f32 %v4068_v51, 0.0  ;;  %v3995_v21 = vpop.f32.mrb[24].mxu0 }
 0x546   : > { %3416 = vst.msk [vmem:[%s5755_s27 + $0xb8] sm:$0xff] %vm2229_vm6, %v3384_v26  ;;  %v4070_v52 = vadd.f32 %v5751_v43, %v3995_v21  ;;  %v3290_v25 = vpop.f32.mrb[25].mxu0 }
 0x547   : > { %3415 = vst.msk [vmem:[%s5755_s27 + $0xb0] sm:$0xff] %vm2229_vm6, %v3383_v9  ;;  %v4072_v62 = vadd.f32 %v5751_v43, %v3290_v25 }
 0x548   : > { %v3386_v8 = vmax.f32 %v4070_v52, 0.0 }
 0x549   : > { %v3385_v31 = vmax.f32 %v4072_v62, 0.0  ;;  %v3998_v16 = vpop.f32.mrb[26].mxu0 }
 0x54a   : > { %3418 = vst.msk [vmem:[%s5755_s27 + $0xc8] sm:$0xff] %vm2229_vm6, %v3386_v8  ;;  %v4074_v46 = vadd.f32 %v5751_v43, %v3998_v16  ;;  %v3300_v60 = vpop.f32.mrb[27].mxu0 }
 0x54b   : > { %3417 = vst.msk [vmem:[%s5755_s27 + $0xc0] sm:$0xff] %vm2229_vm6, %v3385_v31  ;;  %v4076_v5 = vadd.f32 %v5751_v43, %v3300_v60 }
 0x54c   : > { %v3388_v38 = vmax.f32 %v4074_v46, 0.0 }
 0x54d   : > { %v3387_v1 = vmax.f32 %v4076_v5, 0.0  ;;  %v4001_v57 = vpop.f32.mrb[28].mxu0 }
 0x54e   : > { %3420 = vst.msk [vmem:[%s5755_s27 + $0xd8] sm:$0xff] %vm2229_vm6, %v3388_v38  ;;  %v4078_v11 = vadd.f32 %v5751_v43, %v4001_v57  ;;  %v3310_v42 = vpop.f32.mrb[29].mxu0 }
 0x54f   : > { %3419 = vst.msk [vmem:[%s5755_s27 + $0xd0] sm:$0xff] %vm2229_vm6, %v3387_v1  ;;  %v4080_v4 = vadd.f32 %v5751_v43, %v3310_v42 }
 0x550   : > { %v3390_v19 = vmax.f32 %v4078_v11, 0.0 }
 0x551   : > { %v3389_v14 = vmax.f32 %v4080_v4, 0.0  ;;  %v4004_v49 = vpop.f32.mrb[30].mxu0 }
 0x552   : > { %3422 = vst.msk [vmem:[%s5755_s27 + $0xe8] sm:$0xff] %vm2229_vm6, %v3390_v19  ;;  %v4082_v30 = vadd.f32 %v5751_v43, %v4004_v49  ;;  %v3320_v55 = vpop.f32.mrb[31].mxu0 }
 0x553   : > { %3421 = vst.msk [vmem:[%s5755_s27 + $0xe0] sm:$0xff] %vm2229_vm6, %v3389_v14  ;;  %v4084_v18 = vadd.f32 %v5751_v43, %v3320_v55 }
 0x554   : > { %v3392_v17 = vmax.f32 %v4082_v30, 0.0 }
 0x555   : > { %v3391_v22 = vmax.f32 %v4084_v18, 0.0 }
 0x556   : > { %3424 = vst.msk [vmem:[%s5755_s27 + $0xf8] sm:$0xff] %vm2229_vm6, %v3392_v17 }
 0x557   : > { %3423 = vst.msk [vmem:[%s5755_s27 + $0xf0] sm:$0xff] %vm2229_vm6, %v3391_v22 }
 0x558   : > { %4211 = shalt.err (!%p4208_p3)
}
 0x559   : > { %s4212_s21 = scalar_lea.hbm %s5850_s22, 4096  ;;  %s4216_s29 = scalar_lea.hbm %s5911_s9, 8192 }
 0x55a   : > { %p4213_p4 = scmp.ne.s32.totalorder %s5850_s22, %s4212_s21  ;;  %p4217_p9 = scmp.lt.u32.totalorder %s5850_s22, %s5911_s9 }
 0x55b   : > { %p4218_p10 = scmp.lt.u32.totalorder %s4216_s29, %s4212_s21  ;;  %p4220_p12 = scmp.lt.u32.totalorder %s4212_s21, %s5850_s22 }
 0x55c   : > { %p4214_p7 = pnand %p4213_p4, %p4361_p5 }
 0x55d   : > { %p4219_p11 = por %p4218_p10, %p4217_p9 }
 0x55e   : > { %p4215_p8 = pneg %p4214_p7 }
 0x55f   : > { %p4221_p13 = por %p4220_p12, %p4219_p11 }
 0x561   : > { %p4222_p0 = pnand %p4221_p13, %p4215_p8 }
 0x563   : > { %4225 = shalt.err (!%p4222_p0)
}
 0x564   : > { %s4272_s23 = smov 128  }
 0x565   : > { %4117 = dma.vmem_to_hbm [thread:$0]  (%p4361_p5), %s5852_s14, 4096, %s5850_s22, %s5860_s13, %s4272_s23, %s4272_s23, %s4263_s28  }
 0x566 PF: > { %p4123_p1 = scmp.ge.s32.totalorder %s4260_s12, 2  ;;  %s3454_s26 = sand.u32 1, %s4248_s30  }
 0x567   : > { %s3455_s24 = scalar_lea.sflag [#allocation4], %s3454_s26 }
 0x568   : > { %p4120_p2 = pnand %p4123_p1, %p4365_p6 }
 0x56a   : > { %4243 = dma.done.wait (!%p4120_p2), %s3455_s24, 4096  }
 0x56b   : > { %4245 = vsyncadd (!%p4120_p2), %s3455_s24, 4294963200  ;;  %p19_p3 = scmp.ge.s32.totalorder %s4348_s15, 4   ;;  %s5917_s30 = smov %s4252_s10 }
 0x56c   : > { %s5918_s10 = smov %s4256_s11  ;;  %s5919_s11 = smov %s4359_s18 }
 0x56d   : > { %s5920_s12 = smov %s4348_s15  ;;  %21 = sbr.rel (!%p19_p3) target bundleno = 3 (0x3), region = 93 }
 0x574   :  { %3460 = vsyncpa [#allocation4], 1 }
 0x575   :  { %3462 = vsyncpa [#allocation4 + $0x1], 1 }

</bundles_post_ra>
